<compile_context>
chip_gen: v5e
topology: v5e:2x2
jax: 0.10.0
libtpu: 0.0.40
codegen_flags: <defaults>
</compile_context>

<pallas_src>
import jax
import jax.numpy as jnp
from jax.experimental import pallas as pl
from jax.experimental.pallas import tpu as pltpu

NUM_POS = 50  # nn.Embedding(50, F) in the PyTorch module


def _pos_embed_kernel(col_ref, row_ref, out_ref):
    """Writes one (batch, channel-half) block of the (B, 2F, H*W) output.

    col_ref : (F, W)       col_embed(arange(W)).T  (pre-sliced / pre-transposed)
    row_ref : (F, H)       row_embed(arange(H)).T
    out_ref : (1, F, H*W)  channel-major block; H*W is the 128-lane axis.

    Grid: (B, 2).  Axis 1 picks the half:
      half 0 -> channels [0, F):   out[c, h*W + w] = col[c, w]   (tile over h)
      half 1 -> channels [F, 2F):  out[c, h*W + w] = row[c, h]   (repeat over w)
    Both halves are built with static-slice stores of (lane-broadcast) pieces:
    pure data movement, bit-exact, no gather / transpose / reshape needed.
    """
    half = pl.program_id(1)
    f, w = col_ref.shape
    h = row_ref.shape[1]

    @pl.when(half == 0)
    def _():
        col_t = col_ref[...].astype(out_ref.dtype)                  # (F, W)
        for i in range(h):                                          # static unroll
            out_ref[0, :, i * w:(i + 1) * w] = col_t

    @pl.when(half == 1)
    def _():
        row_t = row_ref[...].astype(out_ref.dtype)                  # (F, H)
        for i in range(h):                                          # static unroll
            out_ref[0, :, i * w:(i + 1) * w] = jnp.broadcast_to(
                row_t[:, i:i + 1], (f, w))


def position_embedding_learned(x, row_weight, col_weight, *, out_dtype=None):
    """Pallas forward of PositionEmbeddingLearned.  Returns (B, 2F, H, W)."""
    b = x.shape[0]
    h, w = x.shape[-2], x.shape[-1]
    if h > NUM_POS or w > NUM_POS:
        # nn.Embedding(50, F) would raise an index error in PyTorch; a Pallas
        # kernel would silently read OOB otherwise, so guard explicitly.
        raise ValueError(f"H={h}, W={w} must be <= {NUM_POS}")

    num_pos, f = row_weight.shape
    if num_pos != NUM_POS or col_weight.shape != (NUM_POS, f):
        raise ValueError("row/col embedding weights must both be (50, num_pos_feats)")
    if f % 8 != 0:
        # The channel axis is the sublane axis of the output block; keep the
        # half-offset (F) sublane-aligned so every store/block is aligned.
        raise ValueError(f"num_pos_feats={f} must be a multiple of 8")

    dtype = row_weight.dtype if out_dtype is None else jnp.dtype(out_dtype)

    # Tiny (<= 50 x F) layout plumbing stays in the wrapper: slice to the rows
    # actually used (arange lookup == contiguous slice) and transpose to
    # channel-major, so the kernel never gathers / transposes / relayouts.
    col_t = col_weight[:w].astype(dtype).T             # (F, W)
    row_t = row_weight[:h].astype(dtype).T             # (F, H)

    hw = h * w
    pos = pl.pallas_call(
        _pos_embed_kernel,
        out_shape=jax.ShapeDtypeStruct((b, 2 * f, hw), dtype),
        grid=(b, 2),
        in_specs=[
            pl.BlockSpec((f, w), lambda i, c: (0, 0)),   # whole col table each step
            pl.BlockSpec((f, h), lambda i, c: (0, 0)),   # whole row table each step
        ],
        out_specs=pl.BlockSpec((1, f, hw), lambda i, c: (i, c, 0)),
        compiler_params=pltpu.CompilerParams(
            dimension_semantics=("parallel", "parallel")),
    )(col_t, row_t)

    # Free trailing-dim split (row-major, no data movement), NOT a transpose:
    # (B, 2F, H*W) -> (B, 2F, H, W) matches the PyTorch output exactly.
    return pos.reshape(b, 2 * f, h, w)


if __name__ == "__main__":
    key = jax.random.PRNGKey(0)
    k_x, k_row, k_col = jax.random.split(key, 3)

    # Small shapes consistent with the module (module default num_pos_feats=256;
    # 128 keeps the test small while staying layout-realistic).
    B, C, H, W = 2, 4, 16, 16
    F = 128

    x = jax.random.normal(k_x, (B, C, H, W), dtype=jnp.float32)
    row_w = jax.random.uniform(k_row, (NUM_POS, F), dtype=jnp.float32)  # uniform_ init
    col_w = jax.random.uniform(k_col, (NUM_POS, F), dtype=jnp.float32)

    fwd = jax.jit(position_embedding_learned)
    out = jax.block_until_ready(fwd(x, row_w, col_w))

    # Pure-JAX reference mirroring the PyTorch forward exactly.
    x_emb = col_w[:W]                                   # col_embed(arange(W)) -> (W, F)
    y_emb = row_w[:H]                                   # row_embed(arange(H)) -> (H, F)
    pos_ref = jnp.concatenate(
        [jnp.broadcast_to(x_emb[None, :, :], (H, W, F)),
         jnp.broadcast_to(y_emb[:, None, :], (H, W, F))], axis=-1)
    ref = jnp.broadcast_to(jnp.transpose(pos_ref, (2, 0, 1))[None], (B, 2 * F, H, W))

    assert out.shape == (B, 2 * F, H, W), out.shape
    assert out.dtype == row_w.dtype, out.dtype
    if not bool(jnp.array_equal(out, ref)):
        raise SystemExit("Pallas output does not match reference")
    print("KERNEL_OK")
</pallas_src>

<mosaic_0001>
module attributes {stable_mosaic.version = 11 : i64} {
  func.func @_pos_embed_kernel(%arg0: i32, %arg1: i32, %arg2: memref<128x16xf32, #tpu.memory_space<vmem>>, %arg3: memref<128x16xf32, #tpu.memory_space<vmem>>, %arg4: memref<1x128x256xf32, #tpu.memory_space<vmem>>) attributes {dimension_semantics = [#tpu.dimension_semantics<parallel>, #tpu.dimension_semantics<parallel>], iteration_bounds = array<i64: 2, 2>, scalar_prefetch = 0 : i64, scratch_operands = 0 : i64, tpu.core_type = #tpu.core_type<tc>, window_params = [{pipeline_mode = #tpu.pipeline_mode<synchronous>, transform_indices = @transform_0, window_bounds = array<i64: 128, 16>}, {pipeline_mode = #tpu.pipeline_mode<synchronous>, transform_indices = @transform_1, window_bounds = array<i64: 128, 16>}, {transform_indices = @transform_2, window_bounds = array<i64: 1, 128, 256>}]} {
    %c0_i32 = arith.constant 0 : i32
    %0 = arith.cmpi eq, %arg1, %c0_i32 : i32
    %1 = arith.extui %0 : i1 to i32
    %c0_i32_0 = arith.constant 0 : i32
    %2 = arith.cmpi ne, %1, %c0_i32_0 : i32
    scf.if %2 {
      %c0 = arith.constant 0 : index
      %c0_2 = arith.constant 0 : index
      %6 = vector.load %arg2[%c0, %c0_2] : memref<128x16xf32, #tpu.memory_space<vmem>>, vector<128x16xf32>
      %c0_3 = arith.constant 0 : index
      %c0_4 = arith.constant 0 : index
      %c0_5 = arith.constant 0 : index
      %7 = vector.load %arg4[%c0_3, %c0_4, %c0_5] : memref<1x128x256xf32, #tpu.memory_space<vmem>>, vector<1x128x16xf32>
      %8 = vector.shape_cast %7 : vector<1x128x16xf32> to vector<128x16xf32>
      %9 = vector.shape_cast %6 : vector<128x16xf32> to vector<1x128x16xf32>
      tpu.vector_store %arg4[%c0_3, %c0_4, %c0_5], %9 {strides = array<i32>} : memref<1x128x256xf32, #tpu.memory_space<vmem>>, vector<1x128x16xf32>,
      %c0_6 = arith.constant 0 : index
      %c0_7 = arith.constant 0 : index
      %c16 = arith.constant 16 : index
      %10 = vector.load %arg4[%c0_6, %c0_7, %c16] : memref<1x128x256xf32, #tpu.memory_space<vmem>>, vector<1x128x16xf32>
      %11 = vector.shape_cast %10 : vector<1x128x16xf32> to vector<128x16xf32>
      %12 = vector.shape_cast %6 : vector<128x16xf32> to vector<1x128x16xf32>
      tpu.vector_store %arg4[%c0_6, %c0_7, %c16], %12 {strides = array<i32>} : memref<1x128x256xf32, #tpu.memory_space<vmem>>, vector<1x128x16xf32>,
      %c0_8 = arith.constant 0 : index
      %c0_9 = arith.constant 0 : index
      %c32 = arith.constant 32 : index
      %13 = vector.load %arg4[%c0_8, %c0_9, %c32] : memref<1x128x256xf32, #tpu.memory_space<vmem>>, vector<1x128x16xf32>
      %14 = vector.shape_cast %13 : vector<1x128x16xf32> to vector<128x16xf32>
      %15 = vector.shape_cast %6 : vector<128x16xf32> to vector<1x128x16xf32>
      tpu.vector_store %arg4[%c0_8, %c0_9, %c32], %15 {strides = array<i32>} : memref<1x128x256xf32, #tpu.memory_space<vmem>>, vector<1x128x16xf32>,
      %c0_10 = arith.constant 0 : index
      %c0_11 = arith.constant 0 : index
      %c48 = arith.constant 48 : index
      %16 = vector.load %arg4[%c0_10, %c0_11, %c48] : memref<1x128x256xf32, #tpu.memory_space<vmem>>, vector<1x128x16xf32>
      %17 = vector.shape_cast %16 : vector<1x128x16xf32> to vector<128x16xf32>
      %18 = vector.shape_cast %6 : vector<128x16xf32> to vector<1x128x16xf32>
      tpu.vector_store %arg4[%c0_10, %c0_11, %c48], %18 {strides = array<i32>} : memref<1x128x256xf32, #tpu.memory_space<vmem>>, vector<1x128x16xf32>,
      %c0_12 = arith.constant 0 : index
      %c0_13 = arith.constant 0 : index
      %c64 = arith.constant 64 : index
      %19 = vector.load %arg4[%c0_12, %c0_13, %c64] : memref<1x128x256xf32, #tpu.memory_space<vmem>>, vector<1x128x16xf32>
      %20 = vector.shape_cast %19 : vector<1x128x16xf32> to vector<128x16xf32>
      %21 = vector.shape_cast %6 : vector<128x16xf32> to vector<1x128x16xf32>
      tpu.vector_store %arg4[%c0_12, %c0_13, %c64], %21 {strides = array<i32>} : memref<1x128x256xf32, #tpu.memory_space<vmem>>, vector<1x128x16xf32>,
      %c0_14 = arith.constant 0 : index
      %c0_15 = arith.constant 0 : index
      %c80 = arith.constant 80 : index
      %22 = vector.load %arg4[%c0_14, %c0_15, %c80] : memref<1x128x256xf32, #tpu.memory_space<vmem>>, vector<1x128x16xf32>
      %23 = vector.shape_cast %22 : vector<1x128x16xf32> to vector<128x16xf32>
      %24 = vector.shape_cast %6 : vector<128x16xf32> to vector<1x128x16xf32>
      tpu.vector_store %arg4[%c0_14, %c0_15, %c80], %24 {strides = array<i32>} : memref<1x128x256xf32, #tpu.memory_space<vmem>>, vector<1x128x16xf32>,
      %c0_16 = arith.constant 0 : index
      %c0_17 = arith.constant 0 : index
      %c96 = arith.constant 96 : index
      %25 = vector.load %arg4[%c0_16, %c0_17, %c96] : memref<1x128x256xf32, #tpu.memory_space<vmem>>, vector<1x128x16xf32>
      %26 = vector.shape_cast %25 : vector<1x128x16xf32> to vector<128x16xf32>
      %27 = vector.shape_cast %6 : vector<128x16xf32> to vector<1x128x16xf32>
      tpu.vector_store %arg4[%c0_16, %c0_17, %c96], %27 {strides = array<i32>} : memref<1x128x256xf32, #tpu.memory_space<vmem>>, vector<1x128x16xf32>,
      %c0_18 = arith.constant 0 : index
      %c0_19 = arith.constant 0 : index
      %c112 = arith.constant 112 : index
      %28 = vector.load %arg4[%c0_18, %c0_19, %c112] : memref<1x128x256xf32, #tpu.memory_space<vmem>>, vector<1x128x16xf32>
      %29 = vector.shape_cast %28 : vector<1x128x16xf32> to vector<128x16xf32>
      %30 = vector.shape_cast %6 : vector<128x16xf32> to vector<1x128x16xf32>
      tpu.vector_store %arg4[%c0_18, %c0_19, %c112], %30 {strides = array<i32>} : memref<1x128x256xf32, #tpu.memory_space<vmem>>, vector<1x128x16xf32>,
      %c0_20 = arith.constant 0 : index
      %c0_21 = arith.constant 0 : index
      %c128 = arith.constant 128 : index
      %31 = vector.load %arg4[%c0_20, %c0_21, %c128] : memref<1x128x256xf32, #tpu.memory_space<vmem>>, vector<1x128x16xf32>
      %32 = vector.shape_cast %31 : vector<1x128x16xf32> to vector<128x16xf32>
      %33 = vector.shape_cast %6 : vector<128x16xf32> to vector<1x128x16xf32>
      tpu.vector_store %arg4[%c0_20, %c0_21, %c128], %33 {strides = array<i32>} : memref<1x128x256xf32, #tpu.memory_space<vmem>>, vector<1x128x16xf32>,
      %c0_22 = arith.constant 0 : index
      %c0_23 = arith.constant 0 : index
      %c144 = arith.constant 144 : index
      %34 = vector.load %arg4[%c0_22, %c0_23, %c144] : memref<1x128x256xf32, #tpu.memory_space<vmem>>, vector<1x128x16xf32>
      %35 = vector.shape_cast %34 : vector<1x128x16xf32> to vector<128x16xf32>
      %36 = vector.shape_cast %6 : vector<128x16xf32> to vector<1x128x16xf32>
      tpu.vector_store %arg4[%c0_22, %c0_23, %c144], %36 {strides = array<i32>} : memref<1x128x256xf32, #tpu.memory_space<vmem>>, vector<1x128x16xf32>,
      %c0_24 = arith.constant 0 : index
      %c0_25 = arith.constant 0 : index
      %c160 = arith.constant 160 : index
      %37 = vector.load %arg4[%c0_24, %c0_25, %c160] : memref<1x128x256xf32, #tpu.memory_space<vmem>>, vector<1x128x16xf32>
      %38 = vector.shape_cast %37 : vector<1x128x16xf32> to vector<128x16xf32>
      %39 = vector.shape_cast %6 : vector<128x16xf32> to vector<1x128x16xf32>
      tpu.vector_store %arg4[%c0_24, %c0_25, %c160], %39 {strides = array<i32>} : memref<1x128x256xf32, #tpu.memory_space<vmem>>, vector<1x128x16xf32>,
      %c0_26 = arith.constant 0 : index
      %c0_27 = arith.constant 0 : index
      %c176 = arith.constant 176 : index
      %40 = vector.load %arg4[%c0_26, %c0_27, %c176] : memref<1x128x256xf32, #tpu.memory_space<vmem>>, vector<1x128x16xf32>
      %41 = vector.shape_cast %40 : vector<1x128x16xf32> to vector<128x16xf32>
      %42 = vector.shape_cast %6 : vector<128x16xf32> to vector<1x128x16xf32>
      tpu.vector_store %arg4[%c0_26, %c0_27, %c176], %42 {strides = array<i32>} : memref<1x128x256xf32, #tpu.memory_space<vmem>>, vector<1x128x16xf32>,
      %c0_28 = arith.constant 0 : index
      %c0_29 = arith.constant 0 : index
      %c192 = arith.constant 192 : index
      %43 = vector.load %arg4[%c0_28, %c0_29, %c192] : memref<1x128x256xf32, #tpu.memory_space<vmem>>, vector<1x128x16xf32>
      %44 = vector.shape_cast %43 : vector<1x128x16xf32> to vector<128x16xf32>
      %45 = vector.shape_cast %6 : vector<128x16xf32> to vector<1x128x16xf32>
      tpu.vector_store %arg4[%c0_28, %c0_29, %c192], %45 {strides = array<i32>} : memref<1x128x256xf32, #tpu.memory_space<vmem>>, vector<1x128x16xf32>,
      %c0_30 = arith.constant 0 : index
      %c0_31 = arith.constant 0 : index
      %c208 = arith.constant 208 : index
      %46 = vector.load %arg4[%c0_30, %c0_31, %c208] : memref<1x128x256xf32, #tpu.memory_space<vmem>>, vector<1x128x16xf32>
      %47 = vector.shape_cast %46 : vector<1x128x16xf32> to vector<128x16xf32>
      %48 = vector.shape_cast %6 : vector<128x16xf32> to vector<1x128x16xf32>
      tpu.vector_store %arg4[%c0_30, %c0_31, %c208], %48 {strides = array<i32>} : memref<1x128x256xf32, #tpu.memory_space<vmem>>, vector<1x128x16xf32>,
      %c0_32 = arith.constant 0 : index
      %c0_33 = arith.constant 0 : index
      %c224 = arith.constant 224 : index
      %49 = vector.load %arg4[%c0_32, %c0_33, %c224] : memref<1x128x256xf32, #tpu.memory_space<vmem>>, vector<1x128x16xf32>
      %50 = vector.shape_cast %49 : vector<1x128x16xf32> to vector<128x16xf32>
      %51 = vector.shape_cast %6 : vector<128x16xf32> to vector<1x128x16xf32>
      tpu.vector_store %arg4[%c0_32, %c0_33, %c224], %51 {strides = array<i32>} : memref<1x128x256xf32, #tpu.memory_space<vmem>>, vector<1x128x16xf32>,
      %c0_34 = arith.constant 0 : index
      %c0_35 = arith.constant 0 : index
      %c240 = arith.constant 240 : index
      %52 = vector.load %arg4[%c0_34, %c0_35, %c240] : memref<1x128x256xf32, #tpu.memory_space<vmem>>, vector<1x128x16xf32>
      %53 = vector.shape_cast %52 : vector<1x128x16xf32> to vector<128x16xf32>
      %54 = vector.shape_cast %6 : vector<128x16xf32> to vector<1x128x16xf32>
      tpu.vector_store %arg4[%c0_34, %c0_35, %c240], %54 {strides = array<i32>} : memref<1x128x256xf32, #tpu.memory_space<vmem>>, vector<1x128x16xf32>,
    } else {
    }
    %c1_i32 = arith.constant 1 : i32
    %3 = arith.cmpi eq, %arg1, %c1_i32 : i32
    %4 = arith.extui %3 : i1 to i32
    %c0_i32_1 = arith.constant 0 : i32
    %5 = arith.cmpi ne, %4, %c0_i32_1 : i32
    scf.if %5 {
      %c0 = arith.constant 0 : index
      %c0_2 = arith.constant 0 : index
      %6 = vector.load %arg3[%c0, %c0_2] : memref<128x16xf32, #tpu.memory_space<vmem>>, vector<128x16xf32>
      %7 = vector.extract_strided_slice %6 {offsets = [0, 0], sizes = [128, 1], strides = [1, 1]} : vector<128x16xf32> to vector<128x1xf32>
      %8 = vector.shape_cast %7 : vector<128x1xf32> to vector<128x1xf32>
      %9 = vector.broadcast %8 : vector<128x1xf32> to vector<128x16xf32>
      %c0_3 = arith.constant 0 : index
      %c0_4 = arith.constant 0 : index
      %c0_5 = arith.constant 0 : index
      %10 = vector.load %arg4[%c0_3, %c0_4, %c0_5] : memref<1x128x256xf32, #tpu.memory_space<vmem>>, vector<1x128x16xf32>
      %11 = vector.shape_cast %10 : vector<1x128x16xf32> to vector<128x16xf32>
      %12 = vector.shape_cast %9 : vector<128x16xf32> to vector<1x128x16xf32>
      tpu.vector_store %arg4[%c0_3, %c0_4, %c0_5], %12 {strides = array<i32>} : memref<1x128x256xf32, #tpu.memory_space<vmem>>, vector<1x128x16xf32>,
      %13 = vector.extract_strided_slice %6 {offsets = [0, 1], sizes = [128, 1], strides = [1, 1]} : vector<128x16xf32> to vector<128x1xf32>
      %14 = vector.shape_cast %13 : vector<128x1xf32> to vector<128x1xf32>
      %15 = vector.broadcast %14 : vector<128x1xf32> to vector<128x16xf32>
      %c0_6 = arith.constant 0 : index
      %c0_7 = arith.constant 0 : index
      %c16 = arith.constant 16 : index
      %16 = vector.load %arg4[%c0_6, %c0_7, %c16] : memref<1x128x256xf32, #tpu.memory_space<vmem>>, vector<1x128x16xf32>
      %17 = vector.shape_cast %16 : vector<1x128x16xf32> to vector<128x16xf32>
      %18 = vector.shape_cast %15 : vector<128x16xf32> to vector<1x128x16xf32>
      tpu.vector_store %arg4[%c0_6, %c0_7, %c16], %18 {strides = array<i32>} : memref<1x128x256xf32, #tpu.memory_space<vmem>>, vector<1x128x16xf32>,
      %19 = vector.extract_strided_slice %6 {offsets = [0, 2], sizes = [128, 1], strides = [1, 1]} : vector<128x16xf32> to vector<128x1xf32>
      %20 = vector.shape_cast %19 : vector<128x1xf32> to vector<128x1xf32>
      %21 = vector.broadcast %20 : vector<128x1xf32> to vector<128x16xf32>
      %c0_8 = arith.constant 0 : index
      %c0_9 = arith.constant 0 : index
      %c32 = arith.constant 32 : index
      %22 = vector.load %arg4[%c0_8, %c0_9, %c32] : memref<1x128x256xf32, #tpu.memory_space<vmem>>, vector<1x128x16xf32>
      %23 = vector.shape_cast %22 : vector<1x128x16xf32> to vector<128x16xf32>
      %24 = vector.shape_cast %21 : vector<128x16xf32> to vector<1x128x16xf32>
      tpu.vector_store %arg4[%c0_8, %c0_9, %c32], %24 {strides = array<i32>} : memref<1x128x256xf32, #tpu.memory_space<vmem>>, vector<1x128x16xf32>,
      %25 = vector.extract_strided_slice %6 {offsets = [0, 3], sizes = [128, 1], strides = [1, 1]} : vector<128x16xf32> to vector<128x1xf32>
      %26 = vector.shape_cast %25 : vector<128x1xf32> to vector<128x1xf32>
      %27 = vector.broadcast %26 : vector<128x1xf32> to vector<128x16xf32>
      %c0_10 = arith.constant 0 : index
      %c0_11 = arith.constant 0 : index
      %c48 = arith.constant 48 : index
      %28 = vector.load %arg4[%c0_10, %c0_11, %c48] : memref<1x128x256xf32, #tpu.memory_space<vmem>>, vector<1x128x16xf32>
      %29 = vector.shape_cast %28 : vector<1x128x16xf32> to vector<128x16xf32>
      %30 = vector.shape_cast %27 : vector<128x16xf32> to vector<1x128x16xf32>
      tpu.vector_store %arg4[%c0_10, %c0_11, %c48], %30 {strides = array<i32>} : memref<1x128x256xf32, #tpu.memory_space<vmem>>, vector<1x128x16xf32>,
      %31 = vector.extract_strided_slice %6 {offsets = [0, 4], sizes = [128, 1], strides = [1, 1]} : vector<128x16xf32> to vector<128x1xf32>
      %32 = vector.shape_cast %31 : vector<128x1xf32> to vector<128x1xf32>
      %33 = vector.broadcast %32 : vector<128x1xf32> to vector<128x16xf32>
      %c0_12 = arith.constant 0 : index
      %c0_13 = arith.constant 0 : index
      %c64 = arith.constant 64 : index
      %34 = vector.load %arg4[%c0_12, %c0_13, %c64] : memref<1x128x256xf32, #tpu.memory_space<vmem>>, vector<1x128x16xf32>
      %35 = vector.shape_cast %34 : vector<1x128x16xf32> to vector<128x16xf32>
      %36 = vector.shape_cast %33 : vector<128x16xf32> to vector<1x128x16xf32>
      tpu.vector_store %arg4[%c0_12, %c0_13, %c64], %36 {strides = array<i32>} : memref<1x128x256xf32, #tpu.memory_space<vmem>>, vector<1x128x16xf32>,
      %37 = vector.extract_strided_slice %6 {offsets = [0, 5], sizes = [128, 1], strides = [1, 1]} : vector<128x16xf32> to vector<128x1xf32>
      %38 = vector.shape_cast %37 : vector<128x1xf32> to vector<128x1xf32>
      %39 = vector.broadcast %38 : vector<128x1xf32> to vector<128x16xf32>
      %c0_14 = arith.constant 0 : index
      %c0_15 = arith.constant 0 : index
      %c80 = arith.constant 80 : index
      %40 = vector.load %arg4[%c0_14, %c0_15, %c80] : memref<1x128x256xf32, #tpu.memory_space<vmem>>, vector<1x128x16xf32>
      %41 = vector.shape_cast %40 : vector<1x128x16xf32> to vector<128x16xf32>
      %42 = vector.shape_cast %39 : vector<128x16xf32> to vector<1x128x16xf32>
      tpu.vector_store %arg4[%c0_14, %c0_15, %c80], %42 {strides = array<i32>} : memref<1x128x256xf32, #tpu.memory_space<vmem>>, vector<1x128x16xf32>,
      %43 = vector.extract_strided_slice %6 {offsets = [0, 6], sizes = [128, 1], strides = [1, 1]} : vector<128x16xf32> to vector<128x1xf32>
      %44 = vector.shape_cast %43 : vector<128x1xf32> to vector<128x1xf32>
      %45 = vector.broadcast %44 : vector<128x1xf32> to vector<128x16xf32>
      %c0_16 = arith.constant 0 : index
      %c0_17 = arith.constant 0 : index
      %c96 = arith.constant 96 : index
      %46 = vector.load %arg4[%c0_16, %c0_17, %c96] : memref<1x128x256xf32, #tpu.memory_space<vmem>>, vector<1x128x16xf32>
      %47 = vector.shape_cast %46 : vector<1x128x16xf32> to vector<128x16xf32>
      %48 = vector.shape_cast %45 : vector<128x16xf32> to vector<1x128x16xf32>
      tpu.vector_store %arg4[%c0_16, %c0_17, %c96], %48 {strides = array<i32>} : memref<1x128x256xf32, #tpu.memory_space<vmem>>, vector<1x128x16xf32>,
      %49 = vector.extract_strided_slice %6 {offsets = [0, 7], sizes = [128, 1], strides = [1, 1]} : vector<128x16xf32> to vector<128x1xf32>
      %50 = vector.shape_cast %49 : vector<128x1xf32> to vector<128x1xf32>
      %51 = vector.broadcast %50 : vector<128x1xf32> to vector<128x16xf32>
      %c0_18 = arith.constant 0 : index
      %c0_19 = arith.constant 0 : index
      %c112 = arith.constant 112 : index
      %52 = vector.load %arg4[%c0_18, %c0_19, %c112] : memref<1x128x256xf32, #tpu.memory_space<vmem>>, vector<1x128x16xf32>
      %53 = vector.shape_cast %52 : vector<1x128x16xf32> to vector<128x16xf32>
      %54 = vector.shape_cast %51 : vector<128x16xf32> to vector<1x128x16xf32>
      tpu.vector_store %arg4[%c0_18, %c0_19, %c112], %54 {strides = array<i32>} : memref<1x128x256xf32, #tpu.memory_space<vmem>>, vector<1x128x16xf32>,
      %55 = vector.extract_strided_slice %6 {offsets = [0, 8], sizes = [128, 1], strides = [1, 1]} : vector<128x16xf32> to vector<128x1xf32>
      %56 = vector.shape_cast %55 : vector<128x1xf32> to vector<128x1xf32>
      %57 = vector.broadcast %56 : vector<128x1xf32> to vector<128x16xf32>
      %c0_20 = arith.constant 0 : index
      %c0_21 = arith.constant 0 : index
      %c128 = arith.constant 128 : index
      %58 = vector.load %arg4[%c0_20, %c0_21, %c128] : memref<1x128x256xf32, #tpu.memory_space<vmem>>, vector<1x128x16xf32>
      %59 = vector.shape_cast %58 : vector<1x128x16xf32> to vector<128x16xf32>
      %60 = vector.shape_cast %57 : vector<128x16xf32> to vector<1x128x16xf32>
      tpu.vector_store %arg4[%c0_20, %c0_21, %c128], %60 {strides = array<i32>} : memref<1x128x256xf32, #tpu.memory_space<vmem>>, vector<1x128x16xf32>,
      %61 = vector.extract_strided_slice %6 {offsets = [0, 9], sizes = [128, 1], strides = [1, 1]} : vector<128x16xf32> to vector<128x1xf32>
      %62 = vector.shape_cast %61 : vector<128x1xf32> to vector<128x1xf32>
      %63 = vector.broadcast %62 : vector<128x1xf32> to vector<128x16xf32>
      %c0_22 = arith.constant 0 : index
      %c0_23 = arith.constant 0 : index
      %c144 = arith.constant 144 : index
      %64 = vector.load %arg4[%c0_22, %c0_23, %c144] : memref<1x128x256xf32, #tpu.memory_space<vmem>>, vector<1x128x16xf32>
      %65 = vector.shape_cast %64 : vector<1x128x16xf32> to vector<128x16xf32>
      %66 = vector.shape_cast %63 : vector<128x16xf32> to vector<1x128x16xf32>
      tpu.vector_store %arg4[%c0_22, %c0_23, %c144], %66 {strides = array<i32>} : memref<1x128x256xf32, #tpu.memory_space<vmem>>, vector<1x128x16xf32>,
      %67 = vector.extract_strided_slice %6 {offsets = [0, 10], sizes = [128, 1], strides = [1, 1]} : vector<128x16xf32> to vector<128x1xf32>
      %68 = vector.shape_cast %67 : vector<128x1xf32> to vector<128x1xf32>
      %69 = vector.broadcast %68 : vector<128x1xf32> to vector<128x16xf32>
      %c0_24 = arith.constant 0 : index
      %c0_25 = arith.constant 0 : index
      %c160 = arith.constant 160 : index
      %70 = vector.load %arg4[%c0_24, %c0_25, %c160] : memref<1x128x256xf32, #tpu.memory_space<vmem>>, vector<1x128x16xf32>
      %71 = vector.shape_cast %70 : vector<1x128x16xf32> to vector<128x16xf32>
      %72 = vector.shape_cast %69 : vector<128x16xf32> to vector<1x128x16xf32>
      tpu.vector_store %arg4[%c0_24, %c0_25, %c160], %72 {strides = array<i32>} : memref<1x128x256xf32, #tpu.memory_space<vmem>>, vector<1x128x16xf32>,
      %73 = vector.extract_strided_slice %6 {offsets = [0, 11], sizes = [128, 1], strides = [1, 1]} : vector<128x16xf32> to vector<128x1xf32>
      %74 = vector.shape_cast %73 : vector<128x1xf32> to vector<128x1xf32>
      %75 = vector.broadcast %74 : vector<128x1xf32> to vector<128x16xf32>
      %c0_26 = arith.constant 0 : index
      %c0_27 = arith.constant 0 : index
      %c176 = arith.constant 176 : index
      %76 = vector.load %arg4[%c0_26, %c0_27, %c176] : memref<1x128x256xf32, #tpu.memory_space<vmem>>, vector<1x128x16xf32>
      %77 = vector.shape_cast %76 : vector<1x128x16xf32> to vector<128x16xf32>
      %78 = vector.shape_cast %75 : vector<128x16xf32> to vector<1x128x16xf32>
      tpu.vector_store %arg4[%c0_26, %c0_27, %c176], %78 {strides = array<i32>} : memref<1x128x256xf32, #tpu.memory_space<vmem>>, vector<1x128x16xf32>,
      %79 = vector.extract_strided_slice %6 {offsets = [0, 12], sizes = [128, 1], strides = [1, 1]} : vector<128x16xf32> to vector<128x1xf32>
      %80 = vector.shape_cast %79 : vector<128x1xf32> to vector<128x1xf32>
      %81 = vector.broadcast %80 : vector<128x1xf32> to vector<128x16xf32>
      %c0_28 = arith.constant 0 : index
      %c0_29 = arith.constant 0 : index
      %c192 = arith.constant 192 : index
      %82 = vector.load %arg4[%c0_28, %c0_29, %c192] : memref<1x128x256xf32, #tpu.memory_space<vmem>>, vector<1x128x16xf32>
      %83 = vector.shape_cast %82 : vector<1x128x16xf32> to vector<128x16xf32>
      %84 = vector.shape_cast %81 : vector<128x16xf32> to vector<1x128x16xf32>
      tpu.vector_store %arg4[%c0_28, %c0_29, %c192], %84 {strides = array<i32>} : memref<1x128x256xf32, #tpu.memory_space<vmem>>, vector<1x128x16xf32>,
      %85 = vector.extract_strided_slice %6 {offsets = [0, 13], sizes = [128, 1], strides = [1, 1]} : vector<128x16xf32> to vector<128x1xf32>
      %86 = vector.shape_cast %85 : vector<128x1xf32> to vector<128x1xf32>
      %87 = vector.broadcast %86 : vector<128x1xf32> to vector<128x16xf32>
      %c0_30 = arith.constant 0 : index
      %c0_31 = arith.constant 0 : index
      %c208 = arith.constant 208 : index
      %88 = vector.load %arg4[%c0_30, %c0_31, %c208] : memref<1x128x256xf32, #tpu.memory_space<vmem>>, vector<1x128x16xf32>
      %89 = vector.shape_cast %88 : vector<1x128x16xf32> to vector<128x16xf32>
      %90 = vector.shape_cast %87 : vector<128x16xf32> to vector<1x128x16xf32>
      tpu.vector_store %arg4[%c0_30, %c0_31, %c208], %90 {strides = array<i32>} : memref<1x128x256xf32, #tpu.memory_space<vmem>>, vector<1x128x16xf32>,
      %91 = vector.extract_strided_slice %6 {offsets = [0, 14], sizes = [128, 1], strides = [1, 1]} : vector<128x16xf32> to vector<128x1xf32>
      %92 = vector.shape_cast %91 : vector<128x1xf32> to vector<128x1xf32>
      %93 = vector.broadcast %92 : vector<128x1xf32> to vector<128x16xf32>
      %c0_32 = arith.constant 0 : index
      %c0_33 = arith.constant 0 : index
      %c224 = arith.constant 224 : index
      %94 = vector.load %arg4[%c0_32, %c0_33, %c224] : memref<1x128x256xf32, #tpu.memory_space<vmem>>, vector<1x128x16xf32>
      %95 = vector.shape_cast %94 : vector<1x128x16xf32> to vector<128x16xf32>
      %96 = vector.shape_cast %93 : vector<128x16xf32> to vector<1x128x16xf32>
      tpu.vector_store %arg4[%c0_32, %c0_33, %c224], %96 {strides = array<i32>} : memref<1x128x256xf32, #tpu.memory_space<vmem>>, vector<1x128x16xf32>,
      %97 = vector.extract_strided_slice %6 {offsets = [0, 15], sizes = [128, 1], strides = [1, 1]} : vector<128x16xf32> to vector<128x1xf32>
      %98 = vector.shape_cast %97 : vector<128x1xf32> to vector<128x1xf32>
      %99 = vector.broadcast %98 : vector<128x1xf32> to vector<128x16xf32>
      %c0_34 = arith.constant 0 : index
      %c0_35 = arith.constant 0 : index
      %c240 = arith.constant 240 : index
      %100 = vector.load %arg4[%c0_34, %c0_35, %c240] : memref<1x128x256xf32, #tpu.memory_space<vmem>>, vector<1x128x16xf32>
      %101 = vector.shape_cast %100 : vector<1x128x16xf32> to vector<128x16xf32>
      %102 = vector.shape_cast %99 : vector<128x16xf32> to vector<1x128x16xf32>
      tpu.vector_store %arg4[%c0_34, %c0_35, %c240], %102 {strides = array<i32>} : memref<1x128x256xf32, #tpu.memory_space<vmem>>, vector<1x128x16xf32>,
    } else {
    }
    return
  }
  func.func @transform_0(%arg0: i32, %arg1: i32) -> (i32, i32) {
    %c0_i32 = arith.constant 0 : i32
    %c0_i32_0 = arith.constant 0 : i32
    %c0_i32_1 = arith.constant 0 : i32
    return %c0_i32, %c0_i32_0 : i32, i32
  }
  func.func @transform_1(%arg0: i32, %arg1: i32) -> (i32, i32) {
    %c0_i32 = arith.constant 0 : i32
    %c0_i32_0 = arith.constant 0 : i32
    %c0_i32_1 = arith.constant 0 : i32
    return %c0_i32, %c0_i32_0 : i32, i32
  }
  func.func @transform_2(%arg0: i32, %arg1: i32) -> (i32, i32, i32) {
    %c0_i32 = arith.constant 0 : i32
    %c0_i32_0 = arith.constant 0 : i32
    return %arg0, %arg1, %c0_i32 : i32, i32, i32
  }
}

</mosaic_0001>

<bundles_post_ra>
// kernel: position_embedding_learned.1
= control target key start
LH: loop header
LB: loop body
LE: loop exit
PB: predicated region body
PF: predicated region fallthrough
CT: control target
= control target key end

     0   :  { %s2404_s9 = smov 0   ;;  %s2406_s10 = smov 0   ;;  %s4225_s0 = inlined_call_operand.vmem [shape: f32[128,16], index: 0, kind: input, shape index: {}]   ;;  %s4226_s1 = inlined_call_operand.vmem [shape: f32[128,16], index: 1, kind: input, shape index: {}]   ;;  %s4227_s2 = inlined_call_operand.vmem [shape: f32[2,256,256], index: 2, kind: output, shape index: {}]  }
   0x1   :  { %s2408_s11 = smov 0   ;;  %s2410_s12 = smov 0  }
   0x2   :  { %s2412_s13 = smov 0  }
   0x3 LB: > { %s21_s14 = sadd.s32 1, %s2356_s11  ;;  %s24_s15 = sadd.s32 1, %s2360_s12  ;;  %s2364_s13 = sphi %s2412_s13, %s12_s13   ;;  %s2360_s12 = sphi %s2410_s12, %s4231_s12   ;;  %s2356_s11 = sphi %s2408_s11, %s4230_s11   ;;  %s2352_s10 = sphi %s2406_s10, %s4229_s10   ;;  %s2348_s9 = sphi %s2404_s9, %s4228_s9  }
   0x4   : > { %p22_p0 = scmp.ge.s32.totalorder %s21_s14, 2  ;;  %p2190_p1 = scmp.ge.s32.totalorder %s2364_s13, 1 }
   0x5   : > { %p116_p2 = scmp.lt.s32.totalorder %s2364_s13, 5 }
   0x6   : > { %s4233_s14 = smov (%p22_p0, %s21_s14), 0  ;;  %s4235_s15 = smov (!%p22_p0, %s24_s15), %s2360_s12 }
   0x7   : > { %p117_p3 = pnand %p2190_p1, %p116_p2  ;;  %p26_p4 = scmp.ge.s32.totalorder %s4235_s15, 2 }
   0x8   : > { %s2191_s16 = sshll.u32 (!%p117_p3), %s2348_s9, 4  ;;  %p139_p5 = scmp.lt.s32.totalorder (!%p117_p3), %s2352_s10, 1 }
   0x9   : > { %s4237_s15 = smov (%p26_p4, %s4235_s15), 0  ;;  %120 = sbr.rel (%p117_p3) target bundleno = 1287 (0x507), region = 28 }
   0xa   : > { %p141_p6 = scmp.lt.s32.totalorder (!%p117_p3), %s2191_s16, 31  ;;  %p2195_p7 = scmp.ne.s32.totalorder (!%p117_p3), %s2348_s9, 0 }
   0xe   : > { %s4239_s10 = smov (!%p139_p5, %s2352_s10), 1  ;;  %s4241_s16 = smov (!%p141_p6, %s2191_s16), 31 }
   0xf   : > { %s2193_s17 = sshll.u32 %s4239_s10, 6  ;;  %s2192_s18 = sshll.u32 %s4241_s16, 1 }
  0x10   : > { %s145_s19 = sadd.s32 %s2193_s17, %s2192_s18  ;;  %152 = sbr.rel (%p2195_p7) target bundleno = 435 (0x1b3), region = 32 }
  0x11   : > { %s2194_s20 = sshll.u32 %s145_s19, 3  ;;  %s2366_s28 = smov (!%p2195_p7), 16  }
  0x12   : > { %s2440_s23 = scalar_lea.vmem %s4227_s2, %s2194_s20  ;;  %s2367_s10 = smov (!%p2195_p7), 32  }
  0x13   : > { %s2369_s16 = smov (!%p2195_p7), 64   ;;  %s2370_s17 = smov (!%p2195_p7), 80  }
  0x14   : > { %s2371_s18 = smov (!%p2195_p7), 96   ;;  %s2372_s19 = smov (!%p2195_p7), 112  }
  0x15   : > { %v2446_v0 = vld [vmem:[%s4225_s0] sm:$0xff]  ;;  %v2451_v1 = vld [vmem:[%s4225_s0 + $0x10] sm:$0xff]  ;;  %v2467_v3 = vld [vmem:[%s4225_s0 + $0x8] sm:$0xff]  ;;  %vm169_vm0 = vcmask 130048   ;;  %vm250_vm1 = vcmask 261248   ;;  %vm315_vm2 = vcmask 392448  }
  0x16   : > { %202 = vrot.lane.b32.xlu0 %v2446_v0, %s2366_s28  ;;  %206 = vrot.lane.b32.xlu1 %v2451_v1, %s2366_s28  ;;  %v2460_v2 = vld [vmem:[%s4225_s0 + $0x20] sm:$0xff]  ;;  %v2472_v4 = vld [vmem:[%s4225_s0 + $0x18] sm:$0xff]  ;;  %vm380_vm3 = vcmask 523648   ;;  %vm445_vm4 = vcmask 654848   ;;  %vm510_vm5 = vcmask 786048   ;;  %vm575_vm6 = vcmask 917248  }
  0x17   : > { %210 = vrot.lane.b32.xlu2 %v2460_v2, %s2366_s28  ;;  %v2477_v5 = vld [vmem:[%s4225_s0 + $0x28] sm:$0xff]  ;;  %v2488_v6 = vld [vmem:[%s4225_s0 + $0x30] sm:$0xff]  ;;  %v2493_v7 = vld [vmem:[%s4225_s0 + $0x38] sm:$0xff]  ;;  %vm640_vm7 = vcmask 1048448  }
  0x18   : > { %v2498_v8 = vld [vmem:[%s4225_s0 + $0x40] sm:$0xff]  ;;  %v2509_v9 = vld [vmem:[%s4225_s0 + $0x48] sm:$0xff]  ;;  %v2514_v10 = vld [vmem:[%s4225_s0 + $0x50] sm:$0xff]  ;;  %170 = vst.msk [vmem:[%s2440_s23] sm:$0xff] %vm169_vm0, %v2446_v0 }
  0x19   : > { %v2519_v11 = vld [vmem:[%s4225_s0 + $0x58] sm:$0xff]  ;;  %v2530_v12 = vld [vmem:[%s4225_s0 + $0x60] sm:$0xff]  ;;  %v2535_v13 = vld [vmem:[%s4225_s0 + $0x68] sm:$0xff]  ;;  %657 = vst.msk [vmem:[%s2440_s23 + $0x8] sm:$0xff] %vm169_vm0, %v2446_v0 }
  0x1a   : > { %v2540_v14 = vld [vmem:[%s4225_s0 + $0x70] sm:$0xff]  ;;  %v2551_v15 = vld [vmem:[%s4225_s0 + $0x78] sm:$0xff]  ;;  %171 = vst.msk [vmem:[%s2440_s23 + $0x10] sm:$0xff] %vm169_vm0, %v2467_v3 }
  0x1b   : > { %172 = vst.msk [vmem:[%s2440_s23 + $0x20] sm:$0xff] %vm169_vm0, %v2451_v1 }
  0x1c   : > { %173 = vst.msk [vmem:[%s2440_s23 + $0x30] sm:$0xff] %vm169_vm0, %v2472_v4 }
  0x1d   : > { %174 = vst.msk [vmem:[%s2440_s23 + $0x40] sm:$0xff] %vm169_vm0, %v2460_v2 }
  0x1e   : > { %204 = vrot.lane.b32.xlu0 %v2467_v3, %s2366_s28  ;;  %208 = vrot.lane.b32.xlu1 %v2472_v4, %s2366_s28  ;;  %175 = vst.msk [vmem:[%s2440_s23 + $0x50] sm:$0xff] %vm169_vm0, %v2477_v5 }
  0x1f   : > { %212 = vrot.lane.b32.xlu2 %v2477_v5, %s2366_s28  ;;  %176 = vst.msk [vmem:[%s2440_s23 + $0x60] sm:$0xff] %vm169_vm0, %v2488_v6 }
  0x20   : > { %177 = vst.msk [vmem:[%s2440_s23 + $0x70] sm:$0xff] %vm169_vm0, %v2493_v7 }
  0x21   : > { %178 = vst.msk [vmem:[%s2440_s23 + $0x80] sm:$0xff] %vm169_vm0, %v2498_v8 }
  0x22   : > { %179 = vst.msk [vmem:[%s2440_s23 + $0x90] sm:$0xff] %vm169_vm0, %v2509_v9 }
  0x23   : > { %180 = vst.msk [vmem:[%s2440_s23 + $0xa0] sm:$0xff] %vm169_vm0, %v2514_v10 }
  0x24   : > { %181 = vst.msk [vmem:[%s2440_s23 + $0xb0] sm:$0xff] %vm169_vm0, %v2519_v11 }
  0x25   : > { %182 = vst.msk [vmem:[%s2440_s23 + $0xc0] sm:$0xff] %vm169_vm0, %v2530_v12 }
  0x26   : > { %214 = vrot.lane.b32.xlu0 %v2488_v6, %s2366_s28  ;;  %216 = vrot.lane.b32.xlu1 %v2493_v7, %s2366_s28  ;;  %183 = vst.msk [vmem:[%s2440_s23 + $0xd0] sm:$0xff] %vm169_vm0, %v2535_v13 }
  0x27   : > { %218 = vrot.lane.b32.xlu2 %v2498_v8, %s2366_s28  ;;  %184 = vst.msk [vmem:[%s2440_s23 + $0xe0] sm:$0xff] %vm169_vm0, %v2540_v14 }
  0x28   : > { %185 = vst.msk [vmem:[%s2440_s23 + $0xf0] sm:$0xff] %vm169_vm0, %v2551_v15 }
  0x29   : > { %658 = vst.msk [vmem:[%s2440_s23 + $0x18] sm:$0xff] %vm169_vm0, %v2467_v3 }
  0x2a   : > { %659 = vst.msk [vmem:[%s2440_s23 + $0x28] sm:$0xff] %vm169_vm0, %v2451_v1 }
  0x2b   : > { %660 = vst.msk [vmem:[%s2440_s23 + $0x38] sm:$0xff] %vm169_vm0, %v2472_v4 }
  0x2c   : > { %661 = vst.msk [vmem:[%s2440_s23 + $0x48] sm:$0xff] %vm169_vm0, %v2460_v2 }
  0x2d   : > { %662 = vst.msk [vmem:[%s2440_s23 + $0x58] sm:$0xff] %vm169_vm0, %v2477_v5 }
  0x2e   : > { %220 = vrot.lane.b32.xlu0 %v2509_v9, %s2366_s28  ;;  %222 = vrot.lane.b32.xlu1 %v2514_v10, %s2366_s28  ;;  %663 = vst.msk [vmem:[%s2440_s23 + $0x68] sm:$0xff] %vm169_vm0, %v2488_v6 }
  0x2f   : > { %224 = vrot.lane.b32.xlu2 %v2519_v11, %s2366_s28  ;;  %664 = vst.msk [vmem:[%s2440_s23 + $0x78] sm:$0xff] %vm169_vm0, %v2493_v7 }
  0x30   : > { %665 = vst.msk [vmem:[%s2440_s23 + $0x88] sm:$0xff] %vm169_vm0, %v2498_v8 }
  0x31   : > { %666 = vst.msk [vmem:[%s2440_s23 + $0x98] sm:$0xff] %vm169_vm0, %v2509_v9 }
  0x32   : > { %667 = vst.msk [vmem:[%s2440_s23 + $0xa8] sm:$0xff] %vm169_vm0, %v2514_v10 }
  0x33   : > { %668 = vst.msk [vmem:[%s2440_s23 + $0xb8] sm:$0xff] %vm169_vm0, %v2519_v11 }
  0x34   : > { %669 = vst.msk [vmem:[%s2440_s23 + $0xc8] sm:$0xff] %vm169_vm0, %v2530_v12 }
  0x35   : > { %670 = vst.msk [vmem:[%s2440_s23 + $0xd8] sm:$0xff] %vm169_vm0, %v2535_v13 }
  0x36   : > { %226 = vrot.lane.b32.xlu0 %v2530_v12, %s2366_s28  ;;  %228 = vrot.lane.b32.xlu1 %v2535_v13, %s2366_s28  ;;  %671 = vst.msk [vmem:[%s2440_s23 + $0xe8] sm:$0xff] %vm169_vm0, %v2540_v14 }
  0x37   : > { %230 = vrot.lane.b32.xlu2 %v2540_v14, %s2366_s28  ;;  %672 = vst.msk [vmem:[%s2440_s23 + $0xf8] sm:$0xff] %vm169_vm0, %v2551_v15 }
  0x3e   : > { %232 = vrot.lane.b32.xlu0 %v2551_v15, %s2366_s28  ;;  %267 = vrot.lane.b32.xlu1 %v2446_v0, %s2367_s10  ;;  %s2368_s28 = smov 48  }
  0x3f   : > { %269 = vrot.lane.b32.xlu2 %v2467_v3, %s2367_s10 }
  0x46   : > { %271 = vrot.lane.b32.xlu0 %v2451_v1, %s2367_s10  ;;  %273 = vrot.lane.b32.xlu1 %v2472_v4, %s2367_s10 }
  0x47   : > { %275 = vrot.lane.b32.xlu2 %v2460_v2, %s2367_s10 }
  0x4e   : > { %277 = vrot.lane.b32.xlu0 %v2477_v5, %s2367_s10  ;;  %279 = vrot.lane.b32.xlu1 %v2488_v6, %s2367_s10 }
  0x4f   : > { %281 = vrot.lane.b32.xlu2 %v2493_v7, %s2367_s10 }
  0x56   : > { %283 = vrot.lane.b32.xlu0 %v2498_v8, %s2367_s10  ;;  %285 = vrot.lane.b32.xlu1 %v2509_v9, %s2367_s10 }
  0x57   : > { %287 = vrot.lane.b32.xlu2 %v2514_v10, %s2367_s10 }
  0x5e   : > { %289 = vrot.lane.b32.xlu0 %v2519_v11, %s2367_s10  ;;  %291 = vrot.lane.b32.xlu1 %v2530_v12, %s2367_s10 }
  0x5f   : > { %293 = vrot.lane.b32.xlu2 %v2535_v13, %s2367_s10 }
  0x66   : > { %295 = vrot.lane.b32.xlu0 %v2540_v14, %s2367_s10  ;;  %297 = vrot.lane.b32.xlu1 %v2551_v15, %s2367_s10 }
  0x67   : > { %332 = vrot.lane.b32.xlu2 %v2446_v0, %s2368_s28 }
  0x6e   : > { %334 = vrot.lane.b32.xlu0 %v2467_v3, %s2368_s28  ;;  %336 = vrot.lane.b32.xlu1 %v2451_v1, %s2368_s28 }
  0x6f   : > { %338 = vrot.lane.b32.xlu2 %v2472_v4, %s2368_s28 }
  0x71   : > { %v211_v16 = vpop.permute.xlu2 %210 }
  0x72   : > { %255 = vst.msk [vmem:[%s2440_s23 + $0x40] sm:$0xff] %vm250_vm1, %v211_v16 }
  0x73   : > { %677 = vst.msk [vmem:[%s2440_s23 + $0x48] sm:$0xff] %vm250_vm1, %v211_v16 }
  0x76   : > { %340 = vrot.lane.b32.xlu0 %v2460_v2, %s2368_s28  ;;  %342 = vrot.lane.b32.xlu1 %v2477_v5, %s2368_s28 }
  0x77   : > { %344 = vrot.lane.b32.xlu2 %v2488_v6, %s2368_s28 }
  0x79   : > { %v213_v17 = vpop.permute.xlu2 %212 }
  0x7a   : > { %256 = vst.msk [vmem:[%s2440_s23 + $0x50] sm:$0xff] %vm250_vm1, %v213_v17 }
  0x7b   : > { %678 = vst.msk [vmem:[%s2440_s23 + $0x58] sm:$0xff] %vm250_vm1, %v213_v17 }
  0x7e   : > { %346 = vrot.lane.b32.xlu0 %v2493_v7, %s2368_s28  ;;  %348 = vrot.lane.b32.xlu1 %v2498_v8, %s2368_s28 }
  0x7f   : > { %350 = vrot.lane.b32.xlu2 %v2509_v9, %s2368_s28 }
  0x81   : > { %v219_v18 = vpop.permute.xlu2 %218 }
  0x82   : > { %259 = vst.msk [vmem:[%s2440_s23 + $0x80] sm:$0xff] %vm250_vm1, %v219_v18 }
  0x83   : > { %681 = vst.msk [vmem:[%s2440_s23 + $0x88] sm:$0xff] %vm250_vm1, %v219_v18 }
  0x86   : > { %352 = vrot.lane.b32.xlu0 %v2514_v10, %s2368_s28  ;;  %354 = vrot.lane.b32.xlu1 %v2519_v11, %s2368_s28 }
  0x87   : > { %356 = vrot.lane.b32.xlu2 %v2530_v12, %s2368_s28 }
  0x88   : > { %v203_v19 = vpop.permute.xlu0 %202  ;;  %v207_v20 = vpop.permute.xlu1 %206 }
  0x89   : > { %251 = vst.msk [vmem:[%s2440_s23] sm:$0xff] %vm250_vm1, %v203_v19  ;;  %v225_v21 = vpop.permute.xlu2 %224 }
  0x8a   : > { %673 = vst.msk [vmem:[%s2440_s23 + $0x8] sm:$0xff] %vm250_vm1, %v203_v19 }
  0x8b   : > { %253 = vst.msk [vmem:[%s2440_s23 + $0x20] sm:$0xff] %vm250_vm1, %v207_v20 }
  0x8c   : > { %675 = vst.msk [vmem:[%s2440_s23 + $0x28] sm:$0xff] %vm250_vm1, %v207_v20 }
  0x8d   : > { %262 = vst.msk [vmem:[%s2440_s23 + $0xb0] sm:$0xff] %vm250_vm1, %v225_v21 }
  0x8e   : > { %358 = vrot.lane.b32.xlu0 %v2535_v13, %s2368_s28  ;;  %360 = vrot.lane.b32.xlu1 %v2540_v14, %s2368_s28  ;;  %684 = vst.msk [vmem:[%s2440_s23 + $0xb8] sm:$0xff] %vm250_vm1, %v225_v21 }
  0x8f   : > { %362 = vrot.lane.b32.xlu2 %v2551_v15, %s2368_s28 }
  0x90   : > { %v205_v22 = vpop.permute.xlu0 %204  ;;  %v209_v23 = vpop.permute.xlu1 %208 }
  0x91   : > { %252 = vst.msk [vmem:[%s2440_s23 + $0x10] sm:$0xff] %vm250_vm1, %v205_v22  ;;  %v231_v24 = vpop.permute.xlu2 %230 }
  0x92   : > { %674 = vst.msk [vmem:[%s2440_s23 + $0x18] sm:$0xff] %vm250_vm1, %v205_v22 }
  0x93   : > { %254 = vst.msk [vmem:[%s2440_s23 + $0x30] sm:$0xff] %vm250_vm1, %v209_v23 }
  0x94   : > { %676 = vst.msk [vmem:[%s2440_s23 + $0x38] sm:$0xff] %vm250_vm1, %v209_v23 }
  0x95   : > { %265 = vst.msk [vmem:[%s2440_s23 + $0xe0] sm:$0xff] %vm250_vm1, %v231_v24 }
  0x96   : > { %397 = vrot.lane.b32.xlu0 %v2446_v0, %s2369_s16  ;;  %399 = vrot.lane.b32.xlu1 %v2467_v3, %s2369_s16  ;;  %687 = vst.msk [vmem:[%s2440_s23 + $0xe8] sm:$0xff] %vm250_vm1, %v231_v24 }
  0x97   : > { %401 = vrot.lane.b32.xlu2 %v2451_v1, %s2369_s16 }
  0x98   : > { %v215_v25 = vpop.permute.xlu0 %214  ;;  %v217_v26 = vpop.permute.xlu1 %216 }
  0x99   : > { %257 = vst.msk [vmem:[%s2440_s23 + $0x60] sm:$0xff] %vm250_vm1, %v215_v25  ;;  %v270_v27 = vpop.permute.xlu2 %269 }
  0x9a   : > { %679 = vst.msk [vmem:[%s2440_s23 + $0x68] sm:$0xff] %vm250_vm1, %v215_v25 }
  0x9b   : > { %258 = vst.msk [vmem:[%s2440_s23 + $0x70] sm:$0xff] %vm250_vm1, %v217_v26 }
  0x9c   : > { %680 = vst.msk [vmem:[%s2440_s23 + $0x78] sm:$0xff] %vm250_vm1, %v217_v26 }
  0x9d   : > { %317 = vst.msk [vmem:[%s2440_s23 + $0x10] sm:$0xff] %vm315_vm2, %v270_v27 }
  0x9e   : > { %403 = vrot.lane.b32.xlu0 %v2472_v4, %s2369_s16  ;;  %405 = vrot.lane.b32.xlu1 %v2460_v2, %s2369_s16  ;;  %690 = vst.msk [vmem:[%s2440_s23 + $0x18] sm:$0xff] %vm315_vm2, %v270_v27 }
  0x9f   : > { %407 = vrot.lane.b32.xlu2 %v2477_v5, %s2369_s16 }
  0xa0   : > { %v221_v28 = vpop.permute.xlu0 %220  ;;  %v223_v29 = vpop.permute.xlu1 %222 }
  0xa1   : > { %260 = vst.msk [vmem:[%s2440_s23 + $0x90] sm:$0xff] %vm250_vm1, %v221_v28  ;;  %v276_v30 = vpop.permute.xlu2 %275 }
  0xa2   : > { %682 = vst.msk [vmem:[%s2440_s23 + $0x98] sm:$0xff] %vm250_vm1, %v221_v28 }
  0xa3   : > { %261 = vst.msk [vmem:[%s2440_s23 + $0xa0] sm:$0xff] %vm250_vm1, %v223_v29 }
  0xa4   : > { %683 = vst.msk [vmem:[%s2440_s23 + $0xa8] sm:$0xff] %vm250_vm1, %v223_v29 }
  0xa5   : > { %320 = vst.msk [vmem:[%s2440_s23 + $0x40] sm:$0xff] %vm315_vm2, %v276_v30 }
  0xa6   : > { %409 = vrot.lane.b32.xlu0 %v2488_v6, %s2369_s16  ;;  %411 = vrot.lane.b32.xlu1 %v2493_v7, %s2369_s16  ;;  %693 = vst.msk [vmem:[%s2440_s23 + $0x48] sm:$0xff] %vm315_vm2, %v276_v30 }
  0xa7   : > { %413 = vrot.lane.b32.xlu2 %v2498_v8, %s2369_s16 }
  0xa8   : > { %v227_v31 = vpop.permute.xlu0 %226  ;;  %v229_v32 = vpop.permute.xlu1 %228 }
  0xa9   : > { %263 = vst.msk [vmem:[%s2440_s23 + $0xc0] sm:$0xff] %vm250_vm1, %v227_v31  ;;  %v282_v33 = vpop.permute.xlu2 %281 }
  0xaa   : > { %685 = vst.msk [vmem:[%s2440_s23 + $0xc8] sm:$0xff] %vm250_vm1, %v227_v31 }
  0xab   : > { %264 = vst.msk [vmem:[%s2440_s23 + $0xd0] sm:$0xff] %vm250_vm1, %v229_v32 }
  0xac   : > { %686 = vst.msk [vmem:[%s2440_s23 + $0xd8] sm:$0xff] %vm250_vm1, %v229_v32 }
  0xad   : > { %323 = vst.msk [vmem:[%s2440_s23 + $0x70] sm:$0xff] %vm315_vm2, %v282_v33 }
  0xae   : > { %415 = vrot.lane.b32.xlu0 %v2509_v9, %s2369_s16  ;;  %417 = vrot.lane.b32.xlu1 %v2514_v10, %s2369_s16  ;;  %696 = vst.msk [vmem:[%s2440_s23 + $0x78] sm:$0xff] %vm315_vm2, %v282_v33 }
  0xaf   : > { %419 = vrot.lane.b32.xlu2 %v2519_v11, %s2369_s16 }
  0xb0   : > { %v233_v34 = vpop.permute.xlu0 %232  ;;  %v268_v35 = vpop.permute.xlu1 %267 }
  0xb1   : > { %266 = vst.msk [vmem:[%s2440_s23 + $0xf0] sm:$0xff] %vm250_vm1, %v233_v34  ;;  %v288_v36 = vpop.permute.xlu2 %287 }
  0xb2   : > { %688 = vst.msk [vmem:[%s2440_s23 + $0xf8] sm:$0xff] %vm250_vm1, %v233_v34 }
  0xb3   : > { %316 = vst.msk [vmem:[%s2440_s23] sm:$0xff] %vm315_vm2, %v268_v35 }
  0xb4   : > { %689 = vst.msk [vmem:[%s2440_s23 + $0x8] sm:$0xff] %vm315_vm2, %v268_v35 }
  0xb5   : > { %326 = vst.msk [vmem:[%s2440_s23 + $0xa0] sm:$0xff] %vm315_vm2, %v288_v36 }
  0xb6   : > { %421 = vrot.lane.b32.xlu0 %v2530_v12, %s2369_s16  ;;  %423 = vrot.lane.b32.xlu1 %v2535_v13, %s2369_s16  ;;  %699 = vst.msk [vmem:[%s2440_s23 + $0xa8] sm:$0xff] %vm315_vm2, %v288_v36 }
  0xb7   : > { %425 = vrot.lane.b32.xlu2 %v2540_v14, %s2369_s16 }
  0xb8   : > { %v272_v37 = vpop.permute.xlu0 %271  ;;  %v274_v38 = vpop.permute.xlu1 %273 }
  0xb9   : > { %318 = vst.msk [vmem:[%s2440_s23 + $0x20] sm:$0xff] %vm315_vm2, %v272_v37  ;;  %v294_v39 = vpop.permute.xlu2 %293 }
  0xba   : > { %691 = vst.msk [vmem:[%s2440_s23 + $0x28] sm:$0xff] %vm315_vm2, %v272_v37 }
  0xbb   : > { %319 = vst.msk [vmem:[%s2440_s23 + $0x30] sm:$0xff] %vm315_vm2, %v274_v38 }
  0xbc   : > { %692 = vst.msk [vmem:[%s2440_s23 + $0x38] sm:$0xff] %vm315_vm2, %v274_v38 }
  0xbd   : > { %329 = vst.msk [vmem:[%s2440_s23 + $0xd0] sm:$0xff] %vm315_vm2, %v294_v39 }
  0xbe   : > { %427 = vrot.lane.b32.xlu0 %v2551_v15, %s2369_s16  ;;  %462 = vrot.lane.b32.xlu1 %v2446_v0, %s2370_s17  ;;  %702 = vst.msk [vmem:[%s2440_s23 + $0xd8] sm:$0xff] %vm315_vm2, %v294_v39 }
  0xbf   : > { %464 = vrot.lane.b32.xlu2 %v2467_v3, %s2370_s17 }
  0xc0   : > { %v278_v40 = vpop.permute.xlu0 %277  ;;  %v280_v41 = vpop.permute.xlu1 %279 }
  0xc1   : > { %321 = vst.msk [vmem:[%s2440_s23 + $0x50] sm:$0xff] %vm315_vm2, %v278_v40  ;;  %v333_v42 = vpop.permute.xlu2 %332 }
  0xc2   : > { %694 = vst.msk [vmem:[%s2440_s23 + $0x58] sm:$0xff] %vm315_vm2, %v278_v40 }
  0xc3   : > { %322 = vst.msk [vmem:[%s2440_s23 + $0x60] sm:$0xff] %vm315_vm2, %v280_v41 }
  0xc4   : > { %695 = vst.msk [vmem:[%s2440_s23 + $0x68] sm:$0xff] %vm315_vm2, %v280_v41 }
  0xc5   : > { %381 = vst.msk [vmem:[%s2440_s23] sm:$0xff] %vm380_vm3, %v333_v42 }
  0xc6   : > { %466 = vrot.lane.b32.xlu0 %v2451_v1, %s2370_s17  ;;  %468 = vrot.lane.b32.xlu1 %v2472_v4, %s2370_s17  ;;  %705 = vst.msk [vmem:[%s2440_s23 + $0x8] sm:$0xff] %vm380_vm3, %v333_v42 }
  0xc7   : > { %470 = vrot.lane.b32.xlu2 %v2460_v2, %s2370_s17 }
  0xc8   : > { %v284_v43 = vpop.permute.xlu0 %283  ;;  %v286_v44 = vpop.permute.xlu1 %285 }
  0xc9   : > { %324 = vst.msk [vmem:[%s2440_s23 + $0x80] sm:$0xff] %vm315_vm2, %v284_v43  ;;  %v339_v45 = vpop.permute.xlu2 %338 }
  0xca   : > { %697 = vst.msk [vmem:[%s2440_s23 + $0x88] sm:$0xff] %vm315_vm2, %v284_v43 }
  0xcb   : > { %325 = vst.msk [vmem:[%s2440_s23 + $0x90] sm:$0xff] %vm315_vm2, %v286_v44 }
  0xcc   : > { %698 = vst.msk [vmem:[%s2440_s23 + $0x98] sm:$0xff] %vm315_vm2, %v286_v44 }
  0xcd   : > { %384 = vst.msk [vmem:[%s2440_s23 + $0x30] sm:$0xff] %vm380_vm3, %v339_v45 }
  0xce   : > { %472 = vrot.lane.b32.xlu0 %v2477_v5, %s2370_s17  ;;  %474 = vrot.lane.b32.xlu1 %v2488_v6, %s2370_s17  ;;  %708 = vst.msk [vmem:[%s2440_s23 + $0x38] sm:$0xff] %vm380_vm3, %v339_v45 }
  0xcf   : > { %476 = vrot.lane.b32.xlu2 %v2493_v7, %s2370_s17 }
  0xd0   : > { %v290_v46 = vpop.permute.xlu0 %289  ;;  %v292_v47 = vpop.permute.xlu1 %291 }
  0xd1   : > { %327 = vst.msk [vmem:[%s2440_s23 + $0xb0] sm:$0xff] %vm315_vm2, %v290_v46  ;;  %v345_v48 = vpop.permute.xlu2 %344 }
  0xd2   : > { %700 = vst.msk [vmem:[%s2440_s23 + $0xb8] sm:$0xff] %vm315_vm2, %v290_v46 }
  0xd3   : > { %328 = vst.msk [vmem:[%s2440_s23 + $0xc0] sm:$0xff] %vm315_vm2, %v292_v47 }
  0xd4   : > { %701 = vst.msk [vmem:[%s2440_s23 + $0xc8] sm:$0xff] %vm315_vm2, %v292_v47 }
  0xd5   : > { %387 = vst.msk [vmem:[%s2440_s23 + $0x60] sm:$0xff] %vm380_vm3, %v345_v48 }
  0xd6   : > { %478 = vrot.lane.b32.xlu0 %v2498_v8, %s2370_s17  ;;  %480 = vrot.lane.b32.xlu1 %v2509_v9, %s2370_s17  ;;  %711 = vst.msk [vmem:[%s2440_s23 + $0x68] sm:$0xff] %vm380_vm3, %v345_v48 }
  0xd7   : > { %482 = vrot.lane.b32.xlu2 %v2514_v10, %s2370_s17 }
  0xd8   : > { %v296_v49 = vpop.permute.xlu0 %295  ;;  %v298_v50 = vpop.permute.xlu1 %297 }
  0xd9   : > { %330 = vst.msk [vmem:[%s2440_s23 + $0xe0] sm:$0xff] %vm315_vm2, %v296_v49  ;;  %v351_v51 = vpop.permute.xlu2 %350 }
  0xda   : > { %703 = vst.msk [vmem:[%s2440_s23 + $0xe8] sm:$0xff] %vm315_vm2, %v296_v49 }
  0xdb   : > { %331 = vst.msk [vmem:[%s2440_s23 + $0xf0] sm:$0xff] %vm315_vm2, %v298_v50 }
  0xdc   : > { %704 = vst.msk [vmem:[%s2440_s23 + $0xf8] sm:$0xff] %vm315_vm2, %v298_v50 }
  0xdd   : > { %390 = vst.msk [vmem:[%s2440_s23 + $0x90] sm:$0xff] %vm380_vm3, %v351_v51 }
  0xde   : > { %484 = vrot.lane.b32.xlu0 %v2519_v11, %s2370_s17  ;;  %486 = vrot.lane.b32.xlu1 %v2530_v12, %s2370_s17  ;;  %714 = vst.msk [vmem:[%s2440_s23 + $0x98] sm:$0xff] %vm380_vm3, %v351_v51 }
  0xdf   : > { %488 = vrot.lane.b32.xlu2 %v2535_v13, %s2370_s17 }
  0xe0   : > { %v335_v52 = vpop.permute.xlu0 %334  ;;  %v337_v53 = vpop.permute.xlu1 %336 }
  0xe1   : > { %382 = vst.msk [vmem:[%s2440_s23 + $0x10] sm:$0xff] %vm380_vm3, %v335_v52  ;;  %v357_v54 = vpop.permute.xlu2 %356 }
  0xe2   : > { %706 = vst.msk [vmem:[%s2440_s23 + $0x18] sm:$0xff] %vm380_vm3, %v335_v52 }
  0xe3   : > { %383 = vst.msk [vmem:[%s2440_s23 + $0x20] sm:$0xff] %vm380_vm3, %v337_v53 }
  0xe4   : > { %707 = vst.msk [vmem:[%s2440_s23 + $0x28] sm:$0xff] %vm380_vm3, %v337_v53 }
  0xe5   : > { %393 = vst.msk [vmem:[%s2440_s23 + $0xc0] sm:$0xff] %vm380_vm3, %v357_v54 }
  0xe6   : > { %490 = vrot.lane.b32.xlu0 %v2540_v14, %s2370_s17  ;;  %492 = vrot.lane.b32.xlu1 %v2551_v15, %s2370_s17  ;;  %717 = vst.msk [vmem:[%s2440_s23 + $0xc8] sm:$0xff] %vm380_vm3, %v357_v54 }
  0xe7   : > { %527 = vrot.lane.b32.xlu2 %v2446_v0, %s2371_s18 }
  0xe8   : > { %v341_v55 = vpop.permute.xlu0 %340  ;;  %v343_v56 = vpop.permute.xlu1 %342 }
  0xe9   : > { %385 = vst.msk [vmem:[%s2440_s23 + $0x40] sm:$0xff] %vm380_vm3, %v341_v55  ;;  %v363_v57 = vpop.permute.xlu2 %362 }
  0xea   : > { %709 = vst.msk [vmem:[%s2440_s23 + $0x48] sm:$0xff] %vm380_vm3, %v341_v55 }
  0xeb   : > { %386 = vst.msk [vmem:[%s2440_s23 + $0x50] sm:$0xff] %vm380_vm3, %v343_v56 }
  0xec   : > { %710 = vst.msk [vmem:[%s2440_s23 + $0x58] sm:$0xff] %vm380_vm3, %v343_v56 }
  0xed   : > { %396 = vst.msk [vmem:[%s2440_s23 + $0xf0] sm:$0xff] %vm380_vm3, %v363_v57 }
  0xee   : > { %529 = vrot.lane.b32.xlu0 %v2467_v3, %s2371_s18  ;;  %531 = vrot.lane.b32.xlu1 %v2451_v1, %s2371_s18  ;;  %720 = vst.msk [vmem:[%s2440_s23 + $0xf8] sm:$0xff] %vm380_vm3, %v363_v57 }
  0xef   : > { %533 = vrot.lane.b32.xlu2 %v2472_v4, %s2371_s18 }
  0xf0   : > { %v347_v58 = vpop.permute.xlu0 %346  ;;  %v349_v59 = vpop.permute.xlu1 %348 }
  0xf1   : > { %388 = vst.msk [vmem:[%s2440_s23 + $0x70] sm:$0xff] %vm380_vm3, %v347_v58  ;;  %v402_v60 = vpop.permute.xlu2 %401 }
  0xf2   : > { %712 = vst.msk [vmem:[%s2440_s23 + $0x78] sm:$0xff] %vm380_vm3, %v347_v58 }
  0xf3   : > { %389 = vst.msk [vmem:[%s2440_s23 + $0x80] sm:$0xff] %vm380_vm3, %v349_v59 }
  0xf4   : > { %713 = vst.msk [vmem:[%s2440_s23 + $0x88] sm:$0xff] %vm380_vm3, %v349_v59 }
  0xf5   : > { %448 = vst.msk [vmem:[%s2440_s23 + $0x20] sm:$0xff] %vm445_vm4, %v402_v60 }
  0xf6   : > { %535 = vrot.lane.b32.xlu0 %v2460_v2, %s2371_s18  ;;  %537 = vrot.lane.b32.xlu1 %v2477_v5, %s2371_s18  ;;  %723 = vst.msk [vmem:[%s2440_s23 + $0x28] sm:$0xff] %vm445_vm4, %v402_v60 }
  0xf7   : > { %539 = vrot.lane.b32.xlu2 %v2488_v6, %s2371_s18 }
  0xf8   : > { %v353_v61 = vpop.permute.xlu0 %352  ;;  %v355_v62 = vpop.permute.xlu1 %354 }
  0xf9   : > { %391 = vst.msk [vmem:[%s2440_s23 + $0xa0] sm:$0xff] %vm380_vm3, %v353_v61  ;;  %v408_v63 = vpop.permute.xlu2 %407 }
  0xfa   : > { %715 = vst.msk [vmem:[%s2440_s23 + $0xa8] sm:$0xff] %vm380_vm3, %v353_v61 }
  0xfb   : > { %392 = vst.msk [vmem:[%s2440_s23 + $0xb0] sm:$0xff] %vm380_vm3, %v355_v62 }
  0xfc   : > { %716 = vst.msk [vmem:[%s2440_s23 + $0xb8] sm:$0xff] %vm380_vm3, %v355_v62 }
  0xfd   : > { %451 = vst.msk [vmem:[%s2440_s23 + $0x50] sm:$0xff] %vm445_vm4, %v408_v63 }
  0xfe   : > { %541 = vrot.lane.b32.xlu0 %v2493_v7, %s2371_s18  ;;  %543 = vrot.lane.b32.xlu1 %v2498_v8, %s2371_s18  ;;  %726 = vst.msk [vmem:[%s2440_s23 + $0x58] sm:$0xff] %vm445_vm4, %v408_v63 }
  0xff   : > { %545 = vrot.lane.b32.xlu2 %v2509_v9, %s2371_s18 }
 0x100   : > { %v359_v16 = vpop.permute.xlu0 %358  ;;  %v361_v17 = vpop.permute.xlu1 %360 }
 0x101   : > { %394 = vst.msk [vmem:[%s2440_s23 + $0xd0] sm:$0xff] %vm380_vm3, %v359_v16  ;;  %v414_v18 = vpop.permute.xlu2 %413 }
 0x102   : > { %718 = vst.msk [vmem:[%s2440_s23 + $0xd8] sm:$0xff] %vm380_vm3, %v359_v16 }
 0x103   : > { %395 = vst.msk [vmem:[%s2440_s23 + $0xe0] sm:$0xff] %vm380_vm3, %v361_v17 }
 0x104   : > { %719 = vst.msk [vmem:[%s2440_s23 + $0xe8] sm:$0xff] %vm380_vm3, %v361_v17 }
 0x105   : > { %454 = vst.msk [vmem:[%s2440_s23 + $0x80] sm:$0xff] %vm445_vm4, %v414_v18 }
 0x106   : > { %547 = vrot.lane.b32.xlu0 %v2514_v10, %s2371_s18  ;;  %549 = vrot.lane.b32.xlu1 %v2519_v11, %s2371_s18  ;;  %729 = vst.msk [vmem:[%s2440_s23 + $0x88] sm:$0xff] %vm445_vm4, %v414_v18 }
 0x107   : > { %551 = vrot.lane.b32.xlu2 %v2530_v12, %s2371_s18 }
 0x108   : > { %v398_v19 = vpop.permute.xlu0 %397  ;;  %v400_v20 = vpop.permute.xlu1 %399 }
 0x109   : > { %446 = vst.msk [vmem:[%s2440_s23] sm:$0xff] %vm445_vm4, %v398_v19  ;;  %v420_v21 = vpop.permute.xlu2 %419 }
 0x10a   : > { %721 = vst.msk [vmem:[%s2440_s23 + $0x8] sm:$0xff] %vm445_vm4, %v398_v19 }
 0x10b   : > { %447 = vst.msk [vmem:[%s2440_s23 + $0x10] sm:$0xff] %vm445_vm4, %v400_v20 }
 0x10c   : > { %722 = vst.msk [vmem:[%s2440_s23 + $0x18] sm:$0xff] %vm445_vm4, %v400_v20 }
 0x10d   : > { %457 = vst.msk [vmem:[%s2440_s23 + $0xb0] sm:$0xff] %vm445_vm4, %v420_v21 }
 0x10e   : > { %553 = vrot.lane.b32.xlu0 %v2535_v13, %s2371_s18  ;;  %555 = vrot.lane.b32.xlu1 %v2540_v14, %s2371_s18  ;;  %732 = vst.msk [vmem:[%s2440_s23 + $0xb8] sm:$0xff] %vm445_vm4, %v420_v21 }
 0x10f   : > { %557 = vrot.lane.b32.xlu2 %v2551_v15, %s2371_s18 }
 0x110   : > { %v404_v22 = vpop.permute.xlu0 %403  ;;  %v406_v23 = vpop.permute.xlu1 %405 }
 0x111   : > { %449 = vst.msk [vmem:[%s2440_s23 + $0x30] sm:$0xff] %vm445_vm4, %v404_v22  ;;  %v426_v24 = vpop.permute.xlu2 %425 }
 0x112   : > { %724 = vst.msk [vmem:[%s2440_s23 + $0x38] sm:$0xff] %vm445_vm4, %v404_v22 }
 0x113   : > { %450 = vst.msk [vmem:[%s2440_s23 + $0x40] sm:$0xff] %vm445_vm4, %v406_v23 }
 0x114   : > { %725 = vst.msk [vmem:[%s2440_s23 + $0x48] sm:$0xff] %vm445_vm4, %v406_v23 }
 0x115   : > { %460 = vst.msk [vmem:[%s2440_s23 + $0xe0] sm:$0xff] %vm445_vm4, %v426_v24 }
 0x116   : > { %592 = vrot.lane.b32.xlu0 %v2446_v0, %s2372_s19  ;;  %594 = vrot.lane.b32.xlu1 %v2467_v3, %s2372_s19  ;;  %735 = vst.msk [vmem:[%s2440_s23 + $0xe8] sm:$0xff] %vm445_vm4, %v426_v24 }
 0x117   : > { %596 = vrot.lane.b32.xlu2 %v2451_v1, %s2372_s19 }
 0x118   : > { %v410_v25 = vpop.permute.xlu0 %409  ;;  %v412_v26 = vpop.permute.xlu1 %411 }
 0x119   : > { %452 = vst.msk [vmem:[%s2440_s23 + $0x60] sm:$0xff] %vm445_vm4, %v410_v25  ;;  %v465_v0 = vpop.permute.xlu2 %464 }
 0x11a   : > { %727 = vst.msk [vmem:[%s2440_s23 + $0x68] sm:$0xff] %vm445_vm4, %v410_v25 }
 0x11b   : > { %453 = vst.msk [vmem:[%s2440_s23 + $0x70] sm:$0xff] %vm445_vm4, %v412_v26 }
 0x11c   : > { %728 = vst.msk [vmem:[%s2440_s23 + $0x78] sm:$0xff] %vm445_vm4, %v412_v26 }
 0x11d   : > { %512 = vst.msk [vmem:[%s2440_s23 + $0x10] sm:$0xff] %vm510_vm5, %v465_v0 }
 0x11e   : > { %598 = vrot.lane.b32.xlu0 %v2472_v4, %s2372_s19  ;;  %600 = vrot.lane.b32.xlu1 %v2460_v2, %s2372_s19  ;;  %738 = vst.msk [vmem:[%s2440_s23 + $0x18] sm:$0xff] %vm510_vm5, %v465_v0 }
 0x11f   : > { %602 = vrot.lane.b32.xlu2 %v2477_v5, %s2372_s19 }
 0x120   : > { %v416_v1 = vpop.permute.xlu0 %415  ;;  %v418_v3 = vpop.permute.xlu1 %417 }
 0x121   : > { %455 = vst.msk [vmem:[%s2440_s23 + $0x90] sm:$0xff] %vm445_vm4, %v416_v1  ;;  %v471_v4 = vpop.permute.xlu2 %470 }
 0x122   : > { %730 = vst.msk [vmem:[%s2440_s23 + $0x98] sm:$0xff] %vm445_vm4, %v416_v1 }
 0x123   : > { %456 = vst.msk [vmem:[%s2440_s23 + $0xa0] sm:$0xff] %vm445_vm4, %v418_v3 }
 0x124   : > { %731 = vst.msk [vmem:[%s2440_s23 + $0xa8] sm:$0xff] %vm445_vm4, %v418_v3 }
 0x125   : > { %515 = vst.msk [vmem:[%s2440_s23 + $0x40] sm:$0xff] %vm510_vm5, %v471_v4 }
 0x126   : > { %604 = vrot.lane.b32.xlu0 %v2488_v6, %s2372_s19  ;;  %606 = vrot.lane.b32.xlu1 %v2493_v7, %s2372_s19  ;;  %741 = vst.msk [vmem:[%s2440_s23 + $0x48] sm:$0xff] %vm510_vm5, %v471_v4 }
 0x127   : > { %608 = vrot.lane.b32.xlu2 %v2498_v8, %s2372_s19 }
 0x128   : > { %v422_v2 = vpop.permute.xlu0 %421  ;;  %v424_v5 = vpop.permute.xlu1 %423 }
 0x129   : > { %458 = vst.msk [vmem:[%s2440_s23 + $0xc0] sm:$0xff] %vm445_vm4, %v422_v2  ;;  %v477_v6 = vpop.permute.xlu2 %476 }
 0x12a   : > { %733 = vst.msk [vmem:[%s2440_s23 + $0xc8] sm:$0xff] %vm445_vm4, %v422_v2 }
 0x12b   : > { %459 = vst.msk [vmem:[%s2440_s23 + $0xd0] sm:$0xff] %vm445_vm4, %v424_v5 }
 0x12c   : > { %734 = vst.msk [vmem:[%s2440_s23 + $0xd8] sm:$0xff] %vm445_vm4, %v424_v5 }
 0x12d   : > { %518 = vst.msk [vmem:[%s2440_s23 + $0x70] sm:$0xff] %vm510_vm5, %v477_v6 }
 0x12e   : > { %610 = vrot.lane.b32.xlu0 %v2509_v9, %s2372_s19  ;;  %612 = vrot.lane.b32.xlu1 %v2514_v10, %s2372_s19  ;;  %744 = vst.msk [vmem:[%s2440_s23 + $0x78] sm:$0xff] %vm510_vm5, %v477_v6 }
 0x12f   : > { %614 = vrot.lane.b32.xlu2 %v2519_v11, %s2372_s19 }
 0x130   : > { %v428_v7 = vpop.permute.xlu0 %427  ;;  %v463_v8 = vpop.permute.xlu1 %462 }
 0x131   : > { %461 = vst.msk [vmem:[%s2440_s23 + $0xf0] sm:$0xff] %vm445_vm4, %v428_v7  ;;  %v483_v9 = vpop.permute.xlu2 %482 }
 0x132   : > { %736 = vst.msk [vmem:[%s2440_s23 + $0xf8] sm:$0xff] %vm445_vm4, %v428_v7 }
 0x133   : > { %511 = vst.msk [vmem:[%s2440_s23] sm:$0xff] %vm510_vm5, %v463_v8 }
 0x134   : > { %737 = vst.msk [vmem:[%s2440_s23 + $0x8] sm:$0xff] %vm510_vm5, %v463_v8 }
 0x135   : > { %521 = vst.msk [vmem:[%s2440_s23 + $0xa0] sm:$0xff] %vm510_vm5, %v483_v9 }
 0x136   : > { %616 = vrot.lane.b32.xlu0 %v2530_v12, %s2372_s19  ;;  %618 = vrot.lane.b32.xlu1 %v2535_v13, %s2372_s19  ;;  %747 = vst.msk [vmem:[%s2440_s23 + $0xa8] sm:$0xff] %vm510_vm5, %v483_v9 }
 0x137   : > { %620 = vrot.lane.b32.xlu2 %v2540_v14, %s2372_s19 }
 0x138   : > { %v467_v10 = vpop.permute.xlu0 %466  ;;  %v469_v11 = vpop.permute.xlu1 %468 }
 0x139   : > { %513 = vst.msk [vmem:[%s2440_s23 + $0x20] sm:$0xff] %vm510_vm5, %v467_v10  ;;  %v489_v12 = vpop.permute.xlu2 %488 }
 0x13a   : > { %739 = vst.msk [vmem:[%s2440_s23 + $0x28] sm:$0xff] %vm510_vm5, %v467_v10 }
 0x13b   : > { %514 = vst.msk [vmem:[%s2440_s23 + $0x30] sm:$0xff] %vm510_vm5, %v469_v11 }
 0x13c   : > { %740 = vst.msk [vmem:[%s2440_s23 + $0x38] sm:$0xff] %vm510_vm5, %v469_v11 }
 0x13d   : > { %524 = vst.msk [vmem:[%s2440_s23 + $0xd0] sm:$0xff] %vm510_vm5, %v489_v12 }
 0x13e   : > { %622 = vrot.lane.b32.xlu0 %v2551_v15, %s2372_s19  ;;  %750 = vst.msk [vmem:[%s2440_s23 + $0xd8] sm:$0xff] %vm510_vm5, %v489_v12 }
 0x140   : > { %v473_v13 = vpop.permute.xlu0 %472  ;;  %v475_v14 = vpop.permute.xlu1 %474 }
 0x141   : > { %516 = vst.msk [vmem:[%s2440_s23 + $0x50] sm:$0xff] %vm510_vm5, %v473_v13  ;;  %v528_v27 = vpop.permute.xlu2 %527 }
 0x142   : > { %742 = vst.msk [vmem:[%s2440_s23 + $0x58] sm:$0xff] %vm510_vm5, %v473_v13 }
 0x143   : > { %517 = vst.msk [vmem:[%s2440_s23 + $0x60] sm:$0xff] %vm510_vm5, %v475_v14 }
 0x144   : > { %743 = vst.msk [vmem:[%s2440_s23 + $0x68] sm:$0xff] %vm510_vm5, %v475_v14 }
 0x145   : > { %576 = vst.msk [vmem:[%s2440_s23] sm:$0xff] %vm575_vm6, %v528_v27 }
 0x146   : > { %753 = vst.msk [vmem:[%s2440_s23 + $0x8] sm:$0xff] %vm575_vm6, %v528_v27 }
 0x148   : > { %v479_v15 = vpop.permute.xlu0 %478  ;;  %v481_v28 = vpop.permute.xlu1 %480 }
 0x149   : > { %519 = vst.msk [vmem:[%s2440_s23 + $0x80] sm:$0xff] %vm510_vm5, %v479_v15  ;;  %v534_v29 = vpop.permute.xlu2 %533 }
 0x14a   : > { %745 = vst.msk [vmem:[%s2440_s23 + $0x88] sm:$0xff] %vm510_vm5, %v479_v15 }
 0x14b   : > { %520 = vst.msk [vmem:[%s2440_s23 + $0x90] sm:$0xff] %vm510_vm5, %v481_v28 }
 0x14c   : > { %746 = vst.msk [vmem:[%s2440_s23 + $0x98] sm:$0xff] %vm510_vm5, %v481_v28 }
 0x14d   : > { %579 = vst.msk [vmem:[%s2440_s23 + $0x30] sm:$0xff] %vm575_vm6, %v534_v29 }
 0x14e   : > { %756 = vst.msk [vmem:[%s2440_s23 + $0x38] sm:$0xff] %vm575_vm6, %v534_v29 }
 0x150   : > { %v485_v30 = vpop.permute.xlu0 %484  ;;  %v487_v31 = vpop.permute.xlu1 %486 }
 0x151   : > { %522 = vst.msk [vmem:[%s2440_s23 + $0xb0] sm:$0xff] %vm510_vm5, %v485_v30  ;;  %v540_v32 = vpop.permute.xlu2 %539 }
 0x152   : > { %748 = vst.msk [vmem:[%s2440_s23 + $0xb8] sm:$0xff] %vm510_vm5, %v485_v30 }
 0x153   : > { %523 = vst.msk [vmem:[%s2440_s23 + $0xc0] sm:$0xff] %vm510_vm5, %v487_v31 }
 0x154   : > { %749 = vst.msk [vmem:[%s2440_s23 + $0xc8] sm:$0xff] %vm510_vm5, %v487_v31 }
 0x155   : > { %582 = vst.msk [vmem:[%s2440_s23 + $0x60] sm:$0xff] %vm575_vm6, %v540_v32 }
 0x156   : > { %759 = vst.msk [vmem:[%s2440_s23 + $0x68] sm:$0xff] %vm575_vm6, %v540_v32 }
 0x158   : > { %v491_v33 = vpop.permute.xlu0 %490  ;;  %v493_v34 = vpop.permute.xlu1 %492 }
 0x159   : > { %525 = vst.msk [vmem:[%s2440_s23 + $0xe0] sm:$0xff] %vm510_vm5, %v491_v33  ;;  %v546_v35 = vpop.permute.xlu2 %545 }
 0x15a   : > { %751 = vst.msk [vmem:[%s2440_s23 + $0xe8] sm:$0xff] %vm510_vm5, %v491_v33 }
 0x15b   : > { %526 = vst.msk [vmem:[%s2440_s23 + $0xf0] sm:$0xff] %vm510_vm5, %v493_v34 }
 0x15c   : > { %752 = vst.msk [vmem:[%s2440_s23 + $0xf8] sm:$0xff] %vm510_vm5, %v493_v34 }
 0x15d   : > { %585 = vst.msk [vmem:[%s2440_s23 + $0x90] sm:$0xff] %vm575_vm6, %v546_v35 }
 0x15e   : > { %762 = vst.msk [vmem:[%s2440_s23 + $0x98] sm:$0xff] %vm575_vm6, %v546_v35 }
 0x160   : > { %v530_v36 = vpop.permute.xlu0 %529  ;;  %v532_v37 = vpop.permute.xlu1 %531 }
 0x161   : > { %577 = vst.msk [vmem:[%s2440_s23 + $0x10] sm:$0xff] %vm575_vm6, %v530_v36  ;;  %v552_v38 = vpop.permute.xlu2 %551 }
 0x162   : > { %754 = vst.msk [vmem:[%s2440_s23 + $0x18] sm:$0xff] %vm575_vm6, %v530_v36 }
 0x163   : > { %578 = vst.msk [vmem:[%s2440_s23 + $0x20] sm:$0xff] %vm575_vm6, %v532_v37 }
 0x164   : > { %755 = vst.msk [vmem:[%s2440_s23 + $0x28] sm:$0xff] %vm575_vm6, %v532_v37 }
 0x165   : > { %588 = vst.msk [vmem:[%s2440_s23 + $0xc0] sm:$0xff] %vm575_vm6, %v552_v38 }
 0x166   : > { %765 = vst.msk [vmem:[%s2440_s23 + $0xc8] sm:$0xff] %vm575_vm6, %v552_v38 }
 0x168   : > { %v536_v39 = vpop.permute.xlu0 %535  ;;  %v538_v40 = vpop.permute.xlu1 %537 }
 0x169   : > { %580 = vst.msk [vmem:[%s2440_s23 + $0x40] sm:$0xff] %vm575_vm6, %v536_v39  ;;  %v558_v41 = vpop.permute.xlu2 %557 }
 0x16a   : > { %757 = vst.msk [vmem:[%s2440_s23 + $0x48] sm:$0xff] %vm575_vm6, %v536_v39 }
 0x16b   : > { %581 = vst.msk [vmem:[%s2440_s23 + $0x50] sm:$0xff] %vm575_vm6, %v538_v40 }
 0x16c   : > { %758 = vst.msk [vmem:[%s2440_s23 + $0x58] sm:$0xff] %vm575_vm6, %v538_v40 }
 0x16d   : > { %591 = vst.msk [vmem:[%s2440_s23 + $0xf0] sm:$0xff] %vm575_vm6, %v558_v41 }
 0x16e   : > { %768 = vst.msk [vmem:[%s2440_s23 + $0xf8] sm:$0xff] %vm575_vm6, %v558_v41 }
 0x170   : > { %v542_v42 = vpop.permute.xlu0 %541  ;;  %v544_v43 = vpop.permute.xlu1 %543 }
 0x171   : > { %583 = vst.msk [vmem:[%s2440_s23 + $0x70] sm:$0xff] %vm575_vm6, %v542_v42  ;;  %v597_v44 = vpop.permute.xlu2 %596 }
 0x172   : > { %760 = vst.msk [vmem:[%s2440_s23 + $0x78] sm:$0xff] %vm575_vm6, %v542_v42 }
 0x173   : > { %584 = vst.msk [vmem:[%s2440_s23 + $0x80] sm:$0xff] %vm575_vm6, %v544_v43 }
 0x174   : > { %761 = vst.msk [vmem:[%s2440_s23 + $0x88] sm:$0xff] %vm575_vm6, %v544_v43 }
 0x175   : > { %643 = vst.msk [vmem:[%s2440_s23 + $0x20] sm:$0xff] %vm640_vm7, %v597_v44 }
 0x176   : > { %771 = vst.msk [vmem:[%s2440_s23 + $0x28] sm:$0xff] %vm640_vm7, %v597_v44 }
 0x178   : > { %v548_v45 = vpop.permute.xlu0 %547  ;;  %v550_v46 = vpop.permute.xlu1 %549 }
 0x179   : > { %586 = vst.msk [vmem:[%s2440_s23 + $0xa0] sm:$0xff] %vm575_vm6, %v548_v45  ;;  %v603_v47 = vpop.permute.xlu2 %602 }
 0x17a   : > { %763 = vst.msk [vmem:[%s2440_s23 + $0xa8] sm:$0xff] %vm575_vm6, %v548_v45 }
 0x17b   : > { %587 = vst.msk [vmem:[%s2440_s23 + $0xb0] sm:$0xff] %vm575_vm6, %v550_v46 }
 0x17c   : > { %764 = vst.msk [vmem:[%s2440_s23 + $0xb8] sm:$0xff] %vm575_vm6, %v550_v46 }
 0x17d   : > { %646 = vst.msk [vmem:[%s2440_s23 + $0x50] sm:$0xff] %vm640_vm7, %v603_v47 }
 0x17e   : > { %774 = vst.msk [vmem:[%s2440_s23 + $0x58] sm:$0xff] %vm640_vm7, %v603_v47 }
 0x180   : > { %v554_v48 = vpop.permute.xlu0 %553  ;;  %v556_v49 = vpop.permute.xlu1 %555 }
 0x181   : > { %589 = vst.msk [vmem:[%s2440_s23 + $0xd0] sm:$0xff] %vm575_vm6, %v554_v48  ;;  %v609_v50 = vpop.permute.xlu2 %608 }
 0x182   : > { %766 = vst.msk [vmem:[%s2440_s23 + $0xd8] sm:$0xff] %vm575_vm6, %v554_v48 }
 0x183   : > { %590 = vst.msk [vmem:[%s2440_s23 + $0xe0] sm:$0xff] %vm575_vm6, %v556_v49 }
 0x184   : > { %767 = vst.msk [vmem:[%s2440_s23 + $0xe8] sm:$0xff] %vm575_vm6, %v556_v49 }
 0x185   : > { %649 = vst.msk [vmem:[%s2440_s23 + $0x80] sm:$0xff] %vm640_vm7, %v609_v50 }
 0x186   : > { %777 = vst.msk [vmem:[%s2440_s23 + $0x88] sm:$0xff] %vm640_vm7, %v609_v50 }
 0x188   : > { %v593_v51 = vpop.permute.xlu0 %592  ;;  %v595_v52 = vpop.permute.xlu1 %594 }
 0x189   : > { %641 = vst.msk [vmem:[%s2440_s23] sm:$0xff] %vm640_vm7, %v593_v51  ;;  %v615_v53 = vpop.permute.xlu2 %614 }
 0x18a   : > { %769 = vst.msk [vmem:[%s2440_s23 + $0x8] sm:$0xff] %vm640_vm7, %v593_v51 }
 0x18b   : > { %642 = vst.msk [vmem:[%s2440_s23 + $0x10] sm:$0xff] %vm640_vm7, %v595_v52 }
 0x18c   : > { %770 = vst.msk [vmem:[%s2440_s23 + $0x18] sm:$0xff] %vm640_vm7, %v595_v52 }
 0x18d   : > { %652 = vst.msk [vmem:[%s2440_s23 + $0xb0] sm:$0xff] %vm640_vm7, %v615_v53 }
 0x18e   : > { %780 = vst.msk [vmem:[%s2440_s23 + $0xb8] sm:$0xff] %vm640_vm7, %v615_v53 }
 0x190   : > { %v599_v54 = vpop.permute.xlu0 %598  ;;  %v601_v55 = vpop.permute.xlu1 %600 }
 0x191   : > { %644 = vst.msk [vmem:[%s2440_s23 + $0x30] sm:$0xff] %vm640_vm7, %v599_v54  ;;  %v621_v56 = vpop.permute.xlu2 %620 }
 0x192   : > { %772 = vst.msk [vmem:[%s2440_s23 + $0x38] sm:$0xff] %vm640_vm7, %v599_v54 }
 0x193   : > { %645 = vst.msk [vmem:[%s2440_s23 + $0x40] sm:$0xff] %vm640_vm7, %v601_v55 }
 0x194   : > { %773 = vst.msk [vmem:[%s2440_s23 + $0x48] sm:$0xff] %vm640_vm7, %v601_v55 }
 0x195   : > { %655 = vst.msk [vmem:[%s2440_s23 + $0xe0] sm:$0xff] %vm640_vm7, %v621_v56 }
 0x196   : > { %783 = vst.msk [vmem:[%s2440_s23 + $0xe8] sm:$0xff] %vm640_vm7, %v621_v56 }
 0x198   : > { %v605_v57 = vpop.permute.xlu0 %604  ;;  %v607_v58 = vpop.permute.xlu1 %606 }
 0x199   : > { %647 = vst.msk [vmem:[%s2440_s23 + $0x60] sm:$0xff] %vm640_vm7, %v605_v57 }
 0x19a   : > { %775 = vst.msk [vmem:[%s2440_s23 + $0x68] sm:$0xff] %vm640_vm7, %v605_v57 }
 0x19b   : > { %648 = vst.msk [vmem:[%s2440_s23 + $0x70] sm:$0xff] %vm640_vm7, %v607_v58 }
 0x19c   : > { %776 = vst.msk [vmem:[%s2440_s23 + $0x78] sm:$0xff] %vm640_vm7, %v607_v58 }
 0x1a0   : > { %v611_v59 = vpop.permute.xlu0 %610  ;;  %v613_v60 = vpop.permute.xlu1 %612 }
 0x1a1   : > { %650 = vst.msk [vmem:[%s2440_s23 + $0x90] sm:$0xff] %vm640_vm7, %v611_v59 }
 0x1a2   : > { %778 = vst.msk [vmem:[%s2440_s23 + $0x98] sm:$0xff] %vm640_vm7, %v611_v59 }
 0x1a3   : > { %651 = vst.msk [vmem:[%s2440_s23 + $0xa0] sm:$0xff] %vm640_vm7, %v613_v60 }
 0x1a4   : > { %779 = vst.msk [vmem:[%s2440_s23 + $0xa8] sm:$0xff] %vm640_vm7, %v613_v60 }
 0x1a8   : > { %v617_v61 = vpop.permute.xlu0 %616  ;;  %v619_v62 = vpop.permute.xlu1 %618 }
 0x1a9   : > { %653 = vst.msk [vmem:[%s2440_s23 + $0xc0] sm:$0xff] %vm640_vm7, %v617_v61 }
 0x1aa   : > { %781 = vst.msk [vmem:[%s2440_s23 + $0xc8] sm:$0xff] %vm640_vm7, %v617_v61 }
 0x1ab   : > { %654 = vst.msk [vmem:[%s2440_s23 + $0xd0] sm:$0xff] %vm640_vm7, %v619_v62 }
 0x1ac   : > { %782 = vst.msk [vmem:[%s2440_s23 + $0xd8] sm:$0xff] %vm640_vm7, %v619_v62 }
 0x1b0   : > { %v623_v63 = vpop.permute.xlu0 %622 }
 0x1b1   : > { %656 = vst.msk [vmem:[%s2440_s23 + $0xf0] sm:$0xff] %vm640_vm7, %v623_v63 }
 0x1b2   : > { %784 = vst.msk [vmem:[%s2440_s23 + $0xf8] sm:$0xff] %vm640_vm7, %v623_v63 }
 0x1b3 PF: > { %p2196_p8 = scmp.ne.s32.totalorder %s2348_s9, 1 }
 0x1b5   : > { %788 = sbr.rel (%p2196_p8) target bundleno = 1287 (0x507), region = 36 }
 0x1ba   : > { %v3279_v16 = vld [vmem:[%s4226_s1 + $0x20] sm:$0xff]  ;;  %v3284_v17 = vld [vmem:[%s4226_s1 + $0x10] sm:$0xff]  ;;  %v2373_v18 = vmov 0   ;;  %v3297_v20 = vld [vmem:[%s4226_s1 + $0x28] sm:$0xff]  ;;  %v2374_v6 = vmov 1   ;;  %v2375_v7 = vmov 2  }
 0x1bb   : > { %2264 = vset.pattern.permute.xlu2 %v2373_v18  ;;  %2263 = vset.pattern.permute.xlu1 %v2373_v18  ;;  %v3291_v19 = vld [vmem:[%s4226_s1] sm:$0xff]  ;;  %v3302_v21 = vld [vmem:[%s4226_s1 + $0x18] sm:$0xff]  ;;  %v3307_v22 = vld [vmem:[%s4226_s1 + $0x8] sm:$0xff]  ;;  %vm885_vm8 = vcmask 130048   ;;  %v2376_v28 = vmov 3   ;;  %vm966_vm9 = vcmask 261248  }
 0x1bc   : > { %827 = vperm.xlu2 %2264, %v3279_v16   ;;  %817 = vperm.xlu1 %2263, %v3284_v17   ;;  %v3315_v23 = vld [vmem:[%s4226_s1 + $0x40] sm:$0xff]  ;;  %v3320_v24 = vld [vmem:[%s4226_s1 + $0x38] sm:$0xff]  ;;  %v3325_v25 = vld [vmem:[%s4226_s1 + $0x30] sm:$0xff]  ;;  %v2377_v44 = vmov 4   ;;  %vm1047_vm10 = vcmask 392448   ;;  %v2378_v57 = vmov 5  }
 0x1bd   : > { %2262 = vset.pattern.permute.xlu0 %v2373_v18  ;;  %v3333_v26 = vld [vmem:[%s4226_s1 + $0x58] sm:$0xff]  ;;  %v3338_v0 = vld [vmem:[%s4226_s1 + $0x50] sm:$0xff]  ;;  %v3343_v1 = vld [vmem:[%s4226_s1 + $0x48] sm:$0xff]  ;;  %vm1128_vm11 = vcmask 523648   ;;  %vm1209_vm12 = vcmask 654848   ;;  %vm1290_vm13 = vcmask 786048  }
 0x1be   : > { %807 = vperm.xlu0 %2262, %v3291_v19   ;;  %v3351_v3 = vld [vmem:[%s4226_s1 + $0x70] sm:$0xff]  ;;  %v3356_v4 = vld [vmem:[%s4226_s1 + $0x68] sm:$0xff]  ;;  %v3361_v2 = vld [vmem:[%s4226_s1 + $0x60] sm:$0xff]  ;;  %vm1371_vm14 = vcmask 917248   ;;  %vm1452_vm15 = vcmask 1048448  }
 0x1bf   : > { %v3369_v5 = vld [vmem:[%s4226_s1 + $0x78] sm:$0xff] }
 0x1c4   : > { %832 = vperm.xlu2 %2264, %v3297_v20   ;;  %822 = vperm.xlu1 %2263, %v3302_v21  }
 0x1c6   : > { %812 = vperm.xlu0 %2262, %v3307_v22  }
 0x1cc   : > { %847 = vperm.xlu2 %2264, %v3315_v23   ;;  %842 = vperm.xlu1 %2263, %v3320_v24  }
 0x1ce   : > { %837 = vperm.xlu0 %2262, %v3325_v25  }
 0x1d4   : > { %862 = vperm.xlu2 %2264, %v3333_v26   ;;  %857 = vperm.xlu1 %2263, %v3338_v0  }
 0x1d6   : > { %852 = vperm.xlu0 %2262, %v3343_v1  }
 0x1dc   : > { %877 = vperm.xlu2 %2264, %v3351_v3   ;;  %872 = vperm.xlu1 %2263, %v3356_v4  }
 0x1de   : > { %867 = vperm.xlu0 %2262, %v3361_v2  }
 0x1e4   : > { %2266 = vset.pattern.permute.xlu2 %v2374_v6  ;;  %2265 = vset.pattern.permute.xlu1 %v2374_v6 }
 0x1e5   : > { %907 = vperm.xlu2 %2266, %v3307_v22   ;;  %903 = vperm.xlu1 %2265, %v3291_v19  }
 0x1e6   : > { %882 = vperm.xlu0 %2262, %v3369_v5  }
 0x1ed   : > { %919 = vperm.xlu2 %2266, %v3279_v16   ;;  %915 = vperm.xlu1 %2265, %v3302_v21  }
 0x1ee   : > { %2267 = vset.pattern.permute.xlu0 %v2374_v6 }
 0x1ef   : > { %911 = vperm.xlu0 %2267, %v3284_v17  }
 0x1f5   : > { %927 = vperm.xlu2 %2266, %v3325_v25   ;;  %923 = vperm.xlu1 %2265, %v3297_v20  }
 0x1f7   : > { %931 = vperm.xlu0 %2267, %v3320_v24  }
 0x1fd   : > { %939 = vperm.xlu2 %2266, %v3343_v1   ;;  %935 = vperm.xlu1 %2265, %v3315_v23  }
 0x1ff   : > { %943 = vperm.xlu0 %2267, %v3338_v0  }
 0x205   : > { %951 = vperm.xlu2 %2266, %v3361_v2   ;;  %947 = vperm.xlu1 %2265, %v3333_v26  }
 0x207   : > { %955 = vperm.xlu0 %2267, %v3356_v4  }
 0x20d   : > { %963 = vperm.xlu2 %2266, %v3369_v5   ;;  %959 = vperm.xlu1 %2265, %v3351_v3  }
 0x20f   : > { %2268 = vset.pattern.permute.xlu0 %v2375_v7 }
 0x210   : > { %984 = vperm.xlu0 %2268, %v3291_v19  }
 0x215   : > { %2270 = vset.pattern.permute.xlu2 %v2375_v7  ;;  %2269 = vset.pattern.permute.xlu1 %v2375_v7 }
 0x216   : > { %v828_v8 = vpop.permute.xlu2 %827  ;;  %992 = vperm.xlu2 %2270, %v3284_v17   ;;  %988 = vperm.xlu1 %2269, %v3307_v22  }
 0x217   : > { %890 = vst.msk [vmem:[%s2440_s23 + $0x40] sm:$0xff] %vm885_vm8, %v828_v8 }
 0x218   : > { %1004 = vperm.xlu0 %2268, %v3297_v20  }
 0x21e   : > { %v833_v9 = vpop.permute.xlu2 %832  ;;  %1000 = vperm.xlu2 %2270, %v3279_v16   ;;  %996 = vperm.xlu1 %2269, %v3302_v21  }
 0x21f   : > { %891 = vst.msk [vmem:[%s2440_s23 + $0x50] sm:$0xff] %vm885_vm8, %v833_v9 }
 0x220   : > { %1016 = vperm.xlu0 %2268, %v3315_v23  }
 0x226   : > { %v848_v10 = vpop.permute.xlu2 %847  ;;  %1012 = vperm.xlu2 %2270, %v3320_v24   ;;  %1008 = vperm.xlu1 %2269, %v3325_v25  }
 0x227   : > { %894 = vst.msk [vmem:[%s2440_s23 + $0x80] sm:$0xff] %vm885_vm8, %v848_v10 }
 0x228   : > { %1028 = vperm.xlu0 %2268, %v3333_v26  }
 0x22e   : > { %v863_v11 = vpop.permute.xlu2 %862  ;;  %v818_v12 = vpop.permute.xlu1 %817  ;;  %1024 = vperm.xlu2 %2270, %v3338_v0   ;;  %1020 = vperm.xlu1 %2269, %v3343_v1  }
 0x22f   : > { %897 = vst.msk [vmem:[%s2440_s23 + $0xb0] sm:$0xff] %vm885_vm8, %v863_v11 }
 0x230   : > { %888 = vst.msk [vmem:[%s2440_s23 + $0x20] sm:$0xff] %vm885_vm8, %v818_v12  ;;  %v808_v13 = vpop.permute.xlu0 %807  ;;  %1040 = vperm.xlu0 %2268, %v3351_v3  }
 0x231   : > { %886 = vst.msk [vmem:[%s2440_s23] sm:$0xff] %vm885_vm8, %v808_v13  ;;  %v2379_v13 = vmov 6  }
 0x236   : > { %v878_v14 = vpop.permute.xlu2 %877  ;;  %v823_v27 = vpop.permute.xlu1 %822  ;;  %1036 = vperm.xlu2 %2270, %v3356_v4   ;;  %1032 = vperm.xlu1 %2269, %v3361_v2  }
 0x237   : > { %900 = vst.msk [vmem:[%s2440_s23 + $0xe0] sm:$0xff] %vm885_vm8, %v878_v14 }
 0x238   : > { %889 = vst.msk [vmem:[%s2440_s23 + $0x30] sm:$0xff] %vm885_vm8, %v823_v27  ;;  %v813_v15 = vpop.permute.xlu0 %812  ;;  %2272 = vset.pattern.permute.xlu0 %v2376_v28 }
 0x239   : > { %887 = vst.msk [vmem:[%s2440_s23 + $0x10] sm:$0xff] %vm885_vm8, %v813_v15  ;;  %1069 = vperm.xlu0 %2272, %v3307_v22  }
 0x23e   : > { %v843_v29 = vpop.permute.xlu1 %842  ;;  %2271 = vset.pattern.permute.xlu2 %v2376_v28  ;;  %1044 = vperm.xlu1 %2269, %v3369_v5  }
 0x23f   : > { %893 = vst.msk [vmem:[%s2440_s23 + $0x70] sm:$0xff] %vm885_vm8, %v843_v29  ;;  %v908_v30 = vpop.permute.xlu2 %907  ;;  %1065 = vperm.xlu2 %2271, %v3291_v19  }
 0x240   : > { %968 = vst.msk [vmem:[%s2440_s23 + $0x10] sm:$0xff] %vm966_vm9, %v908_v30  ;;  %v838_v31 = vpop.permute.xlu0 %837 }
 0x241   : > { %892 = vst.msk [vmem:[%s2440_s23 + $0x60] sm:$0xff] %vm885_vm8, %v838_v31  ;;  %1089 = vperm.xlu0 %2272, %v3325_v25  }
 0x246   : > { %v858_v32 = vpop.permute.xlu1 %857  ;;  %2273 = vset.pattern.permute.xlu1 %v2376_v28 }
 0x247   : > { %896 = vst.msk [vmem:[%s2440_s23 + $0xa0] sm:$0xff] %vm885_vm8, %v858_v32  ;;  %v920_v33 = vpop.permute.xlu2 %919  ;;  %1077 = vperm.xlu2 %2271, %v3302_v21   ;;  %1073 = vperm.xlu1 %2273, %v3284_v17  }
 0x248   : > { %971 = vst.msk [vmem:[%s2440_s23 + $0x40] sm:$0xff] %vm966_vm9, %v920_v33  ;;  %v853_v34 = vpop.permute.xlu0 %852 }
 0x249   : > { %895 = vst.msk [vmem:[%s2440_s23 + $0x90] sm:$0xff] %vm885_vm8, %v853_v34  ;;  %1101 = vperm.xlu0 %2272, %v3343_v1  }
 0x24e   : > { %v873_v35 = vpop.permute.xlu1 %872 }
 0x24f   : > { %899 = vst.msk [vmem:[%s2440_s23 + $0xd0] sm:$0xff] %vm885_vm8, %v873_v35  ;;  %v928_v36 = vpop.permute.xlu2 %927  ;;  %1085 = vperm.xlu2 %2271, %v3297_v20   ;;  %1081 = vperm.xlu1 %2273, %v3279_v16  }
 0x250   : > { %973 = vst.msk [vmem:[%s2440_s23 + $0x60] sm:$0xff] %vm966_vm9, %v928_v36  ;;  %v868_v37 = vpop.permute.xlu0 %867 }
 0x251   : > { %898 = vst.msk [vmem:[%s2440_s23 + $0xc0] sm:$0xff] %vm885_vm8, %v868_v37  ;;  %1113 = vperm.xlu0 %2272, %v3361_v2  }
 0x257   : > { %v940_v38 = vpop.permute.xlu2 %939  ;;  %1097 = vperm.xlu2 %2271, %v3315_v23   ;;  %1093 = vperm.xlu1 %2273, %v3320_v24   ;;  %v904_v39 = vpop.permute.xlu1 %903 }
 0x258   : > { %976 = vst.msk [vmem:[%s2440_s23 + $0x90] sm:$0xff] %vm966_vm9, %v940_v38  ;;  %v883_v40 = vpop.permute.xlu0 %882 }
 0x259   : > { %967 = vst.msk [vmem:[%s2440_s23] sm:$0xff] %vm966_vm9, %v904_v39  ;;  %1125 = vperm.xlu0 %2272, %v3369_v5  }
 0x25a   : > { %901 = vst.msk [vmem:[%s2440_s23 + $0xf0] sm:$0xff] %vm885_vm8, %v883_v40  ;;  %v2380_v40 = vmov 7  }
 0x25f   : > { %v952_v41 = vpop.permute.xlu2 %951  ;;  %1109 = vperm.xlu2 %2271, %v3333_v26   ;;  %1105 = vperm.xlu1 %2273, %v3338_v0   ;;  %v916_v42 = vpop.permute.xlu1 %915 }
 0x260   : > { %979 = vst.msk [vmem:[%s2440_s23 + $0xc0] sm:$0xff] %vm966_vm9, %v952_v41 }
 0x261   : > { %970 = vst.msk [vmem:[%s2440_s23 + $0x30] sm:$0xff] %vm966_vm9, %v916_v42  ;;  %v912_v43 = vpop.permute.xlu0 %911  ;;  %2276 = vset.pattern.permute.xlu0 %v2377_v44 }
 0x262   : > { %969 = vst.msk [vmem:[%s2440_s23 + $0x20] sm:$0xff] %vm966_vm9, %v912_v43  ;;  %1154 = vperm.xlu0 %2276, %v3284_v17  }
 0x267   : > { %v964_v45 = vpop.permute.xlu2 %963  ;;  %1121 = vperm.xlu2 %2271, %v3351_v3   ;;  %1117 = vperm.xlu1 %2273, %v3356_v4   ;;  %v924_v46 = vpop.permute.xlu1 %923 }
 0x268   : > { %982 = vst.msk [vmem:[%s2440_s23 + $0xf0] sm:$0xff] %vm966_vm9, %v964_v45 }
 0x269   : > { %972 = vst.msk [vmem:[%s2440_s23 + $0x50] sm:$0xff] %vm966_vm9, %v924_v46  ;;  %v932_v47 = vpop.permute.xlu0 %931 }
 0x26a   : > { %974 = vst.msk [vmem:[%s2440_s23 + $0x70] sm:$0xff] %vm966_vm9, %v932_v47  ;;  %1174 = vperm.xlu0 %2276, %v3320_v24  }
 0x26f   : > { %2275 = vset.pattern.permute.xlu2 %v2377_v44  ;;  %2274 = vset.pattern.permute.xlu1 %v2377_v44  ;;  %v936_v48 = vpop.permute.xlu1 %935 }
 0x270   : > { %975 = vst.msk [vmem:[%s2440_s23 + $0x80] sm:$0xff] %vm966_vm9, %v936_v48  ;;  %v993_v49 = vpop.permute.xlu2 %992  ;;  %1150 = vperm.xlu2 %2275, %v3307_v22   ;;  %1146 = vperm.xlu1 %2274, %v3291_v19  }
 0x271   : > { %1050 = vst.msk [vmem:[%s2440_s23 + $0x20] sm:$0xff] %vm1047_vm10, %v993_v49  ;;  %v944_v50 = vpop.permute.xlu0 %943 }
 0x272   : > { %977 = vst.msk [vmem:[%s2440_s23 + $0xa0] sm:$0xff] %vm966_vm9, %v944_v50  ;;  %1186 = vperm.xlu0 %2276, %v3338_v0  }
 0x277   : > { %v948_v51 = vpop.permute.xlu1 %947 }
 0x278   : > { %978 = vst.msk [vmem:[%s2440_s23 + $0xb0] sm:$0xff] %vm966_vm9, %v948_v51  ;;  %v1001_v52 = vpop.permute.xlu2 %1000  ;;  %1162 = vperm.xlu2 %2275, %v3279_v16   ;;  %1158 = vperm.xlu1 %2274, %v3302_v21  }
 0x279   : > { %1052 = vst.msk [vmem:[%s2440_s23 + $0x40] sm:$0xff] %vm1047_vm10, %v1001_v52  ;;  %v956_v53 = vpop.permute.xlu0 %955 }
 0x27a   : > { %980 = vst.msk [vmem:[%s2440_s23 + $0xd0] sm:$0xff] %vm966_vm9, %v956_v53  ;;  %1198 = vperm.xlu0 %2276, %v3356_v4  }
 0x27f   : > { %v960_v54 = vpop.permute.xlu1 %959 }
 0x280   : > { %981 = vst.msk [vmem:[%s2440_s23 + $0xe0] sm:$0xff] %vm966_vm9, %v960_v54  ;;  %v1013_v55 = vpop.permute.xlu2 %1012  ;;  %1170 = vperm.xlu2 %2275, %v3325_v25   ;;  %1166 = vperm.xlu1 %2274, %v3297_v20  }
 0x281   : > { %1055 = vst.msk [vmem:[%s2440_s23 + $0x70] sm:$0xff] %vm1047_vm10, %v1013_v55 }
 0x282   : > { %v985_v56 = vpop.permute.xlu0 %984  ;;  %2277 = vset.pattern.permute.xlu0 %v2378_v57 }
 0x283   : > { %1048 = vst.msk [vmem:[%s2440_s23] sm:$0xff] %vm1047_vm10, %v985_v56  ;;  %1227 = vperm.xlu0 %2277, %v3291_v19  }
 0x288   : > { %v1025_v58 = vpop.permute.xlu2 %1024  ;;  %1182 = vperm.xlu2 %2275, %v3343_v1   ;;  %1178 = vperm.xlu1 %2274, %v3315_v23   ;;  %v989_v59 = vpop.permute.xlu1 %988 }
 0x289   : > { %1058 = vst.msk [vmem:[%s2440_s23 + $0xa0] sm:$0xff] %vm1047_vm10, %v1025_v58 }
 0x28a   : > { %1049 = vst.msk [vmem:[%s2440_s23 + $0x10] sm:$0xff] %vm1047_vm10, %v989_v59  ;;  %v1005_v60 = vpop.permute.xlu0 %1004 }
 0x28b   : > { %1053 = vst.msk [vmem:[%s2440_s23 + $0x50] sm:$0xff] %vm1047_vm10, %v1005_v60  ;;  %1247 = vperm.xlu0 %2277, %v3297_v20  }
 0x290   : > { %v1037_v61 = vpop.permute.xlu2 %1036  ;;  %1194 = vperm.xlu2 %2275, %v3361_v2   ;;  %1190 = vperm.xlu1 %2274, %v3333_v26   ;;  %v997_v62 = vpop.permute.xlu1 %996 }
 0x291   : > { %1061 = vst.msk [vmem:[%s2440_s23 + $0xd0] sm:$0xff] %vm1047_vm10, %v1037_v61 }
 0x292   : > { %1051 = vst.msk [vmem:[%s2440_s23 + $0x30] sm:$0xff] %vm1047_vm10, %v997_v62  ;;  %v1017_v63 = vpop.permute.xlu0 %1016 }
 0x293   : > { %1056 = vst.msk [vmem:[%s2440_s23 + $0x80] sm:$0xff] %vm1047_vm10, %v1017_v63  ;;  %1259 = vperm.xlu0 %2277, %v3315_v23  }
 0x298   : > { %1206 = vperm.xlu2 %2275, %v3369_v5   ;;  %1202 = vperm.xlu1 %2274, %v3351_v3   ;;  %v1009_v18 = vpop.permute.xlu1 %1008 }
 0x299   : > { %1054 = vst.msk [vmem:[%s2440_s23 + $0x60] sm:$0xff] %vm1047_vm10, %v1009_v18  ;;  %v1066_v6 = vpop.permute.xlu2 %1065 }
 0x29a   : > { %1129 = vst.msk [vmem:[%s2440_s23] sm:$0xff] %vm1128_vm11, %v1066_v6  ;;  %v1029_v7 = vpop.permute.xlu0 %1028 }
 0x29b   : > { %1059 = vst.msk [vmem:[%s2440_s23 + $0xb0] sm:$0xff] %vm1047_vm10, %v1029_v7  ;;  %1271 = vperm.xlu0 %2277, %v3333_v26  }
 0x2a0   : > { %2279 = vset.pattern.permute.xlu2 %v2378_v57  ;;  %2278 = vset.pattern.permute.xlu1 %v2378_v57  ;;  %v1021_v8 = vpop.permute.xlu1 %1020  ;;  %v2381_v57 = vmov 8  }
 0x2a1   : > { %1057 = vst.msk [vmem:[%s2440_s23 + $0x90] sm:$0xff] %vm1047_vm10, %v1021_v8  ;;  %1235 = vperm.xlu2 %2279, %v3284_v17   ;;  %v1078_v9 = vpop.permute.xlu2 %1077  ;;  %1231 = vperm.xlu1 %2278, %v3307_v22  }
 0x2a2   : > { %1132 = vst.msk [vmem:[%s2440_s23 + $0x30] sm:$0xff] %vm1128_vm11, %v1078_v9  ;;  %v1041_v10 = vpop.permute.xlu0 %1040 }
 0x2a3   : > { %1062 = vst.msk [vmem:[%s2440_s23 + $0xe0] sm:$0xff] %vm1047_vm10, %v1041_v10  ;;  %1283 = vperm.xlu0 %2277, %v3351_v3  }
 0x2a8   : > { %v1033_v11 = vpop.permute.xlu1 %1032 }
 0x2a9   : > { %1060 = vst.msk [vmem:[%s2440_s23 + $0xc0] sm:$0xff] %vm1047_vm10, %v1033_v11  ;;  %1243 = vperm.xlu2 %2279, %v3279_v16   ;;  %v1086_v12 = vpop.permute.xlu2 %1085  ;;  %1239 = vperm.xlu1 %2278, %v3302_v21  }
 0x2aa   : > { %1134 = vst.msk [vmem:[%s2440_s23 + $0x50] sm:$0xff] %vm1128_vm11, %v1086_v12 }
 0x2ab   : > { %2281 = vset.pattern.permute.xlu0 %v2379_v13  ;;  %v1070_v15 = vpop.permute.xlu0 %1069 }
 0x2ac   : > { %1312 = vperm.xlu0 %2281, %v3307_v22   ;;  %1130 = vst.msk [vmem:[%s2440_s23 + $0x10] sm:$0xff] %vm1128_vm11, %v1070_v15 }
 0x2b0   : > { %v1045_v14 = vpop.permute.xlu1 %1044 }
 0x2b1   : > { %1063 = vst.msk [vmem:[%s2440_s23 + $0xf0] sm:$0xff] %vm1047_vm10, %v1045_v14  ;;  %1255 = vperm.xlu2 %2279, %v3320_v24   ;;  %v1098_v27 = vpop.permute.xlu2 %1097  ;;  %1251 = vperm.xlu1 %2278, %v3325_v25   ;;  %v2382_v14 = vmov 9  }
 0x2b2   : > { %1137 = vst.msk [vmem:[%s2440_s23 + $0x80] sm:$0xff] %vm1128_vm11, %v1098_v27 }
 0x2b3   : > { %v1090_v30 = vpop.permute.xlu0 %1089 }
 0x2b4   : > { %1332 = vperm.xlu0 %2281, %v3325_v25   ;;  %1135 = vst.msk [vmem:[%s2440_s23 + $0x60] sm:$0xff] %vm1128_vm11, %v1090_v30 }
 0x2b9   : > { %1267 = vperm.xlu2 %2279, %v3338_v0   ;;  %v1110_v28 = vpop.permute.xlu2 %1109  ;;  %1263 = vperm.xlu1 %2278, %v3343_v1   ;;  %v1074_v29 = vpop.permute.xlu1 %1073 }
 0x2ba   : > { %1140 = vst.msk [vmem:[%s2440_s23 + $0xb0] sm:$0xff] %vm1128_vm11, %v1110_v28 }
 0x2bb   : > { %1131 = vst.msk [vmem:[%s2440_s23 + $0x20] sm:$0xff] %vm1128_vm11, %v1074_v29  ;;  %v1102_v33 = vpop.permute.xlu0 %1101 }
 0x2bc   : > { %1344 = vperm.xlu0 %2281, %v3343_v1   ;;  %1138 = vst.msk [vmem:[%s2440_s23 + $0x90] sm:$0xff] %vm1128_vm11, %v1102_v33 }
 0x2c1   : > { %1279 = vperm.xlu2 %2279, %v3356_v4   ;;  %v1122_v31 = vpop.permute.xlu2 %1121  ;;  %1275 = vperm.xlu1 %2278, %v3361_v2   ;;  %v1082_v32 = vpop.permute.xlu1 %1081 }
 0x2c2   : > { %1143 = vst.msk [vmem:[%s2440_s23 + $0xe0] sm:$0xff] %vm1128_vm11, %v1122_v31 }
 0x2c3   : > { %1133 = vst.msk [vmem:[%s2440_s23 + $0x40] sm:$0xff] %vm1128_vm11, %v1082_v32  ;;  %v1114_v36 = vpop.permute.xlu0 %1113 }
 0x2c4   : > { %1356 = vperm.xlu0 %2281, %v3361_v2   ;;  %1141 = vst.msk [vmem:[%s2440_s23 + $0xc0] sm:$0xff] %vm1128_vm11, %v1114_v36 }
 0x2c9   : > { %2280 = vset.pattern.permute.xlu2 %v2379_v13  ;;  %1287 = vperm.xlu1 %2278, %v3369_v5   ;;  %v1094_v34 = vpop.permute.xlu1 %1093 }
 0x2ca   : > { %1136 = vst.msk [vmem:[%s2440_s23 + $0x70] sm:$0xff] %vm1128_vm11, %v1094_v34  ;;  %1308 = vperm.xlu2 %2280, %v3291_v19   ;;  %v1151_v35 = vpop.permute.xlu2 %1150 }
 0x2cb   : > { %1211 = vst.msk [vmem:[%s2440_s23 + $0x10] sm:$0xff] %vm1209_vm12, %v1151_v35  ;;  %v1126_v39 = vpop.permute.xlu0 %1125 }
 0x2cc   : > { %1368 = vperm.xlu0 %2281, %v3369_v5   ;;  %1144 = vst.msk [vmem:[%s2440_s23 + $0xf0] sm:$0xff] %vm1128_vm11, %v1126_v39 }
 0x2d1   : > { %2282 = vset.pattern.permute.xlu1 %v2379_v13  ;;  %v1106_v37 = vpop.permute.xlu1 %1105 }
 0x2d2   : > { %1139 = vst.msk [vmem:[%s2440_s23 + $0xa0] sm:$0xff] %vm1128_vm11, %v1106_v37  ;;  %1320 = vperm.xlu2 %2280, %v3302_v21   ;;  %v1163_v38 = vpop.permute.xlu2 %1162  ;;  %1316 = vperm.xlu1 %2282, %v3284_v17  }
 0x2d3   : > { %1214 = vst.msk [vmem:[%s2440_s23 + $0x40] sm:$0xff] %vm1209_vm12, %v1163_v38 }
 0x2d4   : > { %2285 = vset.pattern.permute.xlu0 %v2380_v40  ;;  %v1155_v45 = vpop.permute.xlu0 %1154 }
 0x2d5   : > { %1397 = vperm.xlu0 %2285, %v3284_v17   ;;  %1212 = vst.msk [vmem:[%s2440_s23 + $0x20] sm:$0xff] %vm1209_vm12, %v1155_v45 }
 0x2d9   : > { %v1118_v41 = vpop.permute.xlu1 %1117 }
 0x2da   : > { %1142 = vst.msk [vmem:[%s2440_s23 + $0xd0] sm:$0xff] %vm1128_vm11, %v1118_v41  ;;  %1328 = vperm.xlu2 %2280, %v3297_v20   ;;  %v1171_v42 = vpop.permute.xlu2 %1170  ;;  %1324 = vperm.xlu1 %2282, %v3279_v16  }
 0x2db   : > { %1216 = vst.msk [vmem:[%s2440_s23 + $0x60] sm:$0xff] %vm1209_vm12, %v1171_v42 }
 0x2dc   : > { %v1175_v48 = vpop.permute.xlu0 %1174 }
 0x2dd   : > { %1417 = vperm.xlu0 %2285, %v3320_v24   ;;  %1217 = vst.msk [vmem:[%s2440_s23 + $0x70] sm:$0xff] %vm1209_vm12, %v1175_v48 }
 0x2e2   : > { %1340 = vperm.xlu2 %2280, %v3315_v23   ;;  %v1183_v43 = vpop.permute.xlu2 %1182  ;;  %1336 = vperm.xlu1 %2282, %v3320_v24   ;;  %v1147_v44 = vpop.permute.xlu1 %1146 }
 0x2e3   : > { %1219 = vst.msk [vmem:[%s2440_s23 + $0x90] sm:$0xff] %vm1209_vm12, %v1183_v43  ;;  %v2383_v43 = vmov 10  }
 0x2e4   : > { %1210 = vst.msk [vmem:[%s2440_s23] sm:$0xff] %vm1209_vm12, %v1147_v44  ;;  %v1187_v51 = vpop.permute.xlu0 %1186 }
 0x2e5   : > { %1429 = vperm.xlu0 %2285, %v3338_v0   ;;  %1220 = vst.msk [vmem:[%s2440_s23 + $0xa0] sm:$0xff] %vm1209_vm12, %v1187_v51 }
 0x2ea   : > { %1352 = vperm.xlu2 %2280, %v3333_v26   ;;  %v1195_v46 = vpop.permute.xlu2 %1194  ;;  %1348 = vperm.xlu1 %2282, %v3338_v0   ;;  %v1159_v47 = vpop.permute.xlu1 %1158 }
 0x2eb   : > { %1222 = vst.msk [vmem:[%s2440_s23 + $0xc0] sm:$0xff] %vm1209_vm12, %v1195_v46 }
 0x2ec   : > { %1213 = vst.msk [vmem:[%s2440_s23 + $0x30] sm:$0xff] %vm1209_vm12, %v1159_v47  ;;  %v1199_v54 = vpop.permute.xlu0 %1198 }
 0x2ed   : > { %1441 = vperm.xlu0 %2285, %v3356_v4   ;;  %1223 = vst.msk [vmem:[%s2440_s23 + $0xd0] sm:$0xff] %vm1209_vm12, %v1199_v54 }
 0x2f2   : > { %1364 = vperm.xlu2 %2280, %v3351_v3   ;;  %v1207_v49 = vpop.permute.xlu2 %1206  ;;  %1360 = vperm.xlu1 %2282, %v3356_v4   ;;  %v1167_v50 = vpop.permute.xlu1 %1166 }
 0x2f3   : > { %1225 = vst.msk [vmem:[%s2440_s23 + $0xf0] sm:$0xff] %vm1209_vm12, %v1207_v49 }
 0x2f4   : > { %1215 = vst.msk [vmem:[%s2440_s23 + $0x50] sm:$0xff] %vm1209_vm12, %v1167_v50 }
 0x2f5   : > { %2286 = vset.pattern.permute.xlu0 %v2381_v57  ;;  %v1228_v60 = vpop.permute.xlu0 %1227 }
 0x2f6   : > { %1470 = vperm.xlu0 %2286, %v3291_v19   ;;  %1291 = vst.msk [vmem:[%s2440_s23] sm:$0xff] %vm1290_vm13, %v1228_v60 }
 0x2fa   : > { %2284 = vset.pattern.permute.xlu2 %v2380_v40  ;;  %2283 = vset.pattern.permute.xlu1 %v2380_v40  ;;  %v1179_v52 = vpop.permute.xlu1 %1178 }
 0x2fb   : > { %1218 = vst.msk [vmem:[%s2440_s23 + $0x80] sm:$0xff] %vm1209_vm12, %v1179_v52  ;;  %1393 = vperm.xlu2 %2284, %v3307_v22   ;;  %v1236_v53 = vpop.permute.xlu2 %1235  ;;  %1389 = vperm.xlu1 %2283, %v3291_v19  }
 0x2fc   : > { %1293 = vst.msk [vmem:[%s2440_s23 + $0x20] sm:$0xff] %vm1290_vm13, %v1236_v53 }
 0x2fd   : > { %v1248_v63 = vpop.permute.xlu0 %1247 }
 0x2fe   : > { %1490 = vperm.xlu0 %2286, %v3297_v20   ;;  %1296 = vst.msk [vmem:[%s2440_s23 + $0x50] sm:$0xff] %vm1290_vm13, %v1248_v63 }
 0x302   : > { %v1191_v55 = vpop.permute.xlu1 %1190 }
 0x303   : > { %1221 = vst.msk [vmem:[%s2440_s23 + $0xb0] sm:$0xff] %vm1209_vm12, %v1191_v55  ;;  %1405 = vperm.xlu2 %2284, %v3279_v16   ;;  %v1244_v56 = vpop.permute.xlu2 %1243  ;;  %1401 = vperm.xlu1 %2283, %v3302_v21   ;;  %v2384_v55 = vmov 11  }
 0x304   : > { %1295 = vst.msk [vmem:[%s2440_s23 + $0x40] sm:$0xff] %vm1290_vm13, %v1244_v56 }
 0x305   : > { %v1260_v7 = vpop.permute.xlu0 %1259 }
 0x306   : > { %1502 = vperm.xlu0 %2286, %v3315_v23   ;;  %1299 = vst.msk [vmem:[%s2440_s23 + $0x80] sm:$0xff] %vm1290_vm13, %v1260_v7  ;;  %v3849_v7 = vld [vmem:[%s4226_s1 + $0x18] sm:$0xff] }
 0x30a   : > { %v1203_v58 = vpop.permute.xlu1 %1202 }
 0x30b   : > { %1224 = vst.msk [vmem:[%s2440_s23 + $0xe0] sm:$0xff] %vm1209_vm12, %v1203_v58  ;;  %1413 = vperm.xlu2 %2284, %v3325_v25   ;;  %v1256_v59 = vpop.permute.xlu2 %1255  ;;  %1409 = vperm.xlu1 %2283, %v3297_v20  }
 0x30c   : > { %1298 = vst.msk [vmem:[%s2440_s23 + $0x70] sm:$0xff] %vm1290_vm13, %v1256_v59 }
 0x30d   : > { %v1272_v10 = vpop.permute.xlu0 %1271 }
 0x30e   : > { %1514 = vperm.xlu0 %2286, %v3333_v26   ;;  %1302 = vst.msk [vmem:[%s2440_s23 + $0xb0] sm:$0xff] %vm1290_vm13, %v1272_v10 }
 0x313   : > { %1425 = vperm.xlu2 %2284, %v3343_v1   ;;  %v1268_v61 = vpop.permute.xlu2 %1267  ;;  %1421 = vperm.xlu1 %2283, %v3315_v23   ;;  %v1232_v62 = vpop.permute.xlu1 %1231 }
 0x314   : > { %1301 = vst.msk [vmem:[%s2440_s23 + $0xa0] sm:$0xff] %vm1290_vm13, %v1268_v61  ;;  %v3830_v61 = vld [vmem:[%s4226_s1 + $0x8] sm:$0xff] }
 0x315   : > { %1292 = vst.msk [vmem:[%s2440_s23 + $0x10] sm:$0xff] %vm1290_vm13, %v1232_v62  ;;  %v1284_v13 = vpop.permute.xlu0 %1283  ;;  %v2385_v62 = vmov 12  }
 0x316   : > { %1526 = vperm.xlu0 %2286, %v3351_v3   ;;  %1305 = vst.msk [vmem:[%s2440_s23 + $0xe0] sm:$0xff] %vm1290_vm13, %v1284_v13 }
 0x31b   : > { %1437 = vperm.xlu2 %2284, %v3361_v2   ;;  %v1280_v18 = vpop.permute.xlu2 %1279  ;;  %1433 = vperm.xlu1 %2283, %v3333_v26   ;;  %v1240_v6 = vpop.permute.xlu1 %1239 }
 0x31c   : > { %1304 = vst.msk [vmem:[%s2440_s23 + $0xd0] sm:$0xff] %vm1290_vm13, %v1280_v18  ;;  %v3843_v18 = vld [vmem:[%s4226_s1 + $0x20] sm:$0xff] }
 0x31d   : > { %1294 = vst.msk [vmem:[%s2440_s23 + $0x30] sm:$0xff] %vm1290_vm13, %v1240_v6 }
 0x31e   : > { %2290 = vset.pattern.permute.xlu0 %v2382_v14  ;;  %v1313_v30 = vpop.permute.xlu0 %1312 }
 0x31f   : > { %1554 = vperm.xlu0 %2290, %v3307_v22   ;;  %1373 = vst.msk [vmem:[%s2440_s23 + $0x10] sm:$0xff] %vm1371_vm14, %v1313_v30  ;;  %v3897_v30 = vld [vmem:[%s4226_s1 + $0x60] sm:$0xff] }
 0x323   : > { %1449 = vperm.xlu2 %2284, %v3369_v5   ;;  %1445 = vperm.xlu1 %2283, %v3351_v3   ;;  %v1252_v8 = vpop.permute.xlu1 %1251 }
 0x324   : > { %1297 = vst.msk [vmem:[%s2440_s23 + $0x60] sm:$0xff] %vm1290_vm13, %v1252_v8  ;;  %v1309_v9 = vpop.permute.xlu2 %1308 }
 0x325   : > { %1372 = vst.msk [vmem:[%s2440_s23] sm:$0xff] %vm1371_vm14, %v1309_v9  ;;  %v3859_v9 = vld [vmem:[%s4226_s1 + $0x30] sm:$0xff] }
 0x326   : > { %v1333_v33 = vpop.permute.xlu0 %1332 }
 0x327   : > { %1574 = vperm.xlu0 %2290, %v3325_v25   ;;  %1378 = vst.msk [vmem:[%s2440_s23 + $0x60] sm:$0xff] %vm1371_vm14, %v1333_v33 }
 0x32b   : > { %2288 = vset.pattern.permute.xlu2 %v2381_v57  ;;  %2287 = vset.pattern.permute.xlu1 %v2381_v57  ;;  %v1264_v11 = vpop.permute.xlu1 %1263 }
 0x32c   : > { %1300 = vst.msk [vmem:[%s2440_s23 + $0x90] sm:$0xff] %vm1290_vm13, %v1264_v11  ;;  %1478 = vperm.xlu2 %2288, %v3284_v17   ;;  %v1321_v12 = vpop.permute.xlu2 %1320  ;;  %1474 = vperm.xlu1 %2287, %v3307_v22   ;;  %v3867_v11 = vld [vmem:[%s4226_s1 + $0x38] sm:$0xff] }
 0x32d   : > { %1375 = vst.msk [vmem:[%s2440_s23 + $0x30] sm:$0xff] %vm1371_vm14, %v1321_v12 }
 0x32e   : > { %v1345_v36 = vpop.permute.xlu0 %1344 }
 0x32f   : > { %1586 = vperm.xlu0 %2290, %v3343_v1   ;;  %1381 = vst.msk [vmem:[%s2440_s23 + $0x90] sm:$0xff] %vm1371_vm14, %v1345_v36 }
 0x333   : > { %v1276_v27 = vpop.permute.xlu1 %1275 }
 0x334   : > { %1303 = vst.msk [vmem:[%s2440_s23 + $0xc0] sm:$0xff] %vm1290_vm13, %v1276_v27  ;;  %1486 = vperm.xlu2 %2288, %v3279_v16   ;;  %v1329_v15 = vpop.permute.xlu2 %1328  ;;  %1482 = vperm.xlu1 %2287, %v3302_v21   ;;  %v3884_v27 = vld [vmem:[%s4226_s1 + $0x50] sm:$0xff] }
 0x335   : > { %1377 = vst.msk [vmem:[%s2440_s23 + $0x50] sm:$0xff] %vm1371_vm14, %v1329_v15 }
 0x336   : > { %v1357_v39 = vpop.permute.xlu0 %1356 }
 0x337   : > { %1598 = vperm.xlu0 %2290, %v3361_v2   ;;  %1384 = vst.msk [vmem:[%s2440_s23 + $0xc0] sm:$0xff] %vm1371_vm14, %v1357_v39 }
 0x33b   : > { %v1288_v28 = vpop.permute.xlu1 %1287 }
 0x33c   : > { %1306 = vst.msk [vmem:[%s2440_s23 + $0xf0] sm:$0xff] %vm1290_vm13, %v1288_v28  ;;  %1498 = vperm.xlu2 %2288, %v3320_v24   ;;  %v1341_v29 = vpop.permute.xlu2 %1340  ;;  %1494 = vperm.xlu1 %2287, %v3325_v25  }
 0x33d   : > { %1380 = vst.msk [vmem:[%s2440_s23 + $0x80] sm:$0xff] %vm1371_vm14, %v1341_v29 }
 0x33e   : > { %v1369_v42 = vpop.permute.xlu0 %1368 }
 0x33f   : > { %1610 = vperm.xlu0 %2290, %v3369_v5   ;;  %1387 = vst.msk [vmem:[%s2440_s23 + $0xf0] sm:$0xff] %vm1371_vm14, %v1369_v42  ;;  %v2386_v42 = vmov 13  }
 0x344   : > { %1510 = vperm.xlu2 %2288, %v3338_v0   ;;  %v1353_v31 = vpop.permute.xlu2 %1352  ;;  %1506 = vperm.xlu1 %2287, %v3343_v1   ;;  %v1317_v32 = vpop.permute.xlu1 %1316 }
 0x345   : > { %1383 = vst.msk [vmem:[%s2440_s23 + $0xb0] sm:$0xff] %vm1371_vm14, %v1353_v31  ;;  %v3903_v31 = vld [vmem:[%s4226_s1 + $0x68] sm:$0xff] }
 0x346   : > { %1374 = vst.msk [vmem:[%s2440_s23 + $0x20] sm:$0xff] %vm1371_vm14, %v1317_v32 }
 0x347   : > { %2294 = vset.pattern.permute.xlu0 %v2383_v43 }
 0x348   : > { %1638 = vperm.xlu0 %2294, %v3284_v17  }
 0x34c   : > { %1522 = vperm.xlu2 %2288, %v3356_v4   ;;  %v1365_v34 = vpop.permute.xlu2 %1364  ;;  %1518 = vperm.xlu1 %2287, %v3361_v2   ;;  %v1325_v35 = vpop.permute.xlu1 %1324 }
 0x34d   : > { %1386 = vst.msk [vmem:[%s2440_s23 + $0xe0] sm:$0xff] %vm1371_vm14, %v1365_v34 }
 0x34e   : > { %1376 = vst.msk [vmem:[%s2440_s23 + $0x40] sm:$0xff] %vm1371_vm14, %v1325_v35  ;;  %v3916_v35 = vld [vmem:[%s4226_s1 + $0x78] sm:$0xff] }
 0x350   : > { %1658 = vperm.xlu0 %2294, %v3320_v24  }
 0x354   : > { %2289 = vset.pattern.permute.xlu2 %v2382_v14  ;;  %1530 = vperm.xlu1 %2287, %v3369_v5   ;;  %v1337_v37 = vpop.permute.xlu1 %1336 }
 0x355   : > { %1379 = vst.msk [vmem:[%s2440_s23 + $0x70] sm:$0xff] %vm1371_vm14, %v1337_v37  ;;  %1550 = vperm.xlu2 %2289, %v3291_v19   ;;  %v1394_v38 = vpop.permute.xlu2 %1393  ;;  %v3925_v37 = vld [vmem:[%s4226_s1] sm:$0xff] }
 0x356   : > { %1454 = vst.msk [vmem:[%s2440_s23 + $0x10] sm:$0xff] %vm1452_vm15, %v1394_v38 }
 0x358   : > { %1670 = vperm.xlu0 %2294, %v3338_v0  }
 0x35c   : > { %2291 = vset.pattern.permute.xlu1 %v2382_v14  ;;  %v1349_v40 = vpop.permute.xlu1 %1348  ;;  %v3878_v14 = vld [vmem:[%s4226_s1 + $0x48] sm:$0xff] }
 0x35d   : > { %1382 = vst.msk [vmem:[%s2440_s23 + $0xa0] sm:$0xff] %vm1371_vm14, %v1349_v40  ;;  %1562 = vperm.xlu2 %2289, %v3302_v21   ;;  %v1406_v41 = vpop.permute.xlu2 %1405  ;;  %1558 = vperm.xlu1 %2291, %v3284_v17  }
 0x35e   : > { %1457 = vst.msk [vmem:[%s2440_s23 + $0x40] sm:$0xff] %vm1452_vm15, %v1406_v41 }
 0x360   : > { %1682 = vperm.xlu0 %2294, %v3356_v4  }
 0x364   : > { %v1361_v44 = vpop.permute.xlu1 %1360 }
 0x365   : > { %1385 = vst.msk [vmem:[%s2440_s23 + $0xd0] sm:$0xff] %vm1371_vm14, %v1361_v44  ;;  %1570 = vperm.xlu2 %2289, %v3297_v20   ;;  %v1414_v45 = vpop.permute.xlu2 %1413  ;;  %1566 = vperm.xlu1 %2291, %v3279_v16  }
 0x366   : > { %1459 = vst.msk [vmem:[%s2440_s23 + $0x60] sm:$0xff] %vm1452_vm15, %v1414_v45  ;;  %v3946_v45 = vld [vmem:[%s4226_s1 + $0x28] sm:$0xff] }
 0x368   : > { %2295 = vset.pattern.permute.xlu0 %v2384_v55 }
 0x369   : > { %1710 = vperm.xlu0 %2295, %v3291_v19  }
 0x36d   : > { %1582 = vperm.xlu2 %2289, %v3315_v23   ;;  %v1426_v46 = vpop.permute.xlu2 %1425  ;;  %1578 = vperm.xlu1 %2291, %v3320_v24   ;;  %v1390_v17 = vpop.permute.xlu1 %1389 }
 0x36e   : > { %1462 = vst.msk [vmem:[%s2440_s23 + $0x90] sm:$0xff] %vm1452_vm15, %v1426_v46  ;;  %v1398_v24 = vpop.permute.xlu0 %1397 }
 0x36f   : > { %1453 = vst.msk [vmem:[%s2440_s23] sm:$0xff] %vm1452_vm15, %v1390_v17 }
 0x370   : > { %1455 = vst.msk [vmem:[%s2440_s23 + $0x20] sm:$0xff] %vm1452_vm15, %v1398_v24 }
 0x371   : > { %1730 = vperm.xlu0 %2295, %v3297_v20  }
 0x375   : > { %1594 = vperm.xlu2 %2289, %v3333_v26   ;;  %v1438_v47 = vpop.permute.xlu2 %1437  ;;  %1590 = vperm.xlu1 %2291, %v3338_v0   ;;  %v1402_v48 = vpop.permute.xlu1 %1401 }
 0x376   : > { %1465 = vst.msk [vmem:[%s2440_s23 + $0xc0] sm:$0xff] %vm1452_vm15, %v1438_v47  ;;  %v1418_v0 = vpop.permute.xlu0 %1417  ;;  %v3958_v47 = vld [vmem:[%s4226_s1 + $0x40] sm:$0xff] }
 0x377   : > { %1456 = vst.msk [vmem:[%s2440_s23 + $0x30] sm:$0xff] %vm1452_vm15, %v1402_v48 }
 0x378   : > { %1460 = vst.msk [vmem:[%s2440_s23 + $0x70] sm:$0xff] %vm1452_vm15, %v1418_v0 }
 0x379   : > { %1742 = vperm.xlu0 %2295, %v3315_v23  }
 0x37d   : > { %1606 = vperm.xlu2 %2289, %v3351_v3   ;;  %v1450_v49 = vpop.permute.xlu2 %1449  ;;  %1602 = vperm.xlu1 %2291, %v3356_v4   ;;  %v1410_v50 = vpop.permute.xlu1 %1409 }
 0x37e   : > { %1468 = vst.msk [vmem:[%s2440_s23 + $0xf0] sm:$0xff] %vm1452_vm15, %v1450_v49  ;;  %v1430_v4 = vpop.permute.xlu0 %1429 }
 0x37f   : > { %1458 = vst.msk [vmem:[%s2440_s23 + $0x50] sm:$0xff] %vm1452_vm15, %v1410_v50  ;;  %v3972_v50 = vld [vmem:[%s4226_s1 + $0x58] sm:$0xff] }
 0x380   : > { %1463 = vst.msk [vmem:[%s2440_s23 + $0xa0] sm:$0xff] %vm1452_vm15, %v1430_v4  ;;  %v3986_v4 = vld [vmem:[%s4226_s1 + $0x70] sm:$0xff] }
 0x381   : > { %1754 = vperm.xlu0 %2295, %v3333_v26  }
 0x385   : > { %2293 = vset.pattern.permute.xlu2 %v2383_v43  ;;  %2292 = vset.pattern.permute.xlu1 %v2383_v43  ;;  %v1422_v51 = vpop.permute.xlu1 %1421 }
 0x386   : > { %1461 = vst.msk [vmem:[%s2440_s23 + $0x80] sm:$0xff] %vm1452_vm15, %v1422_v51  ;;  %1634 = vperm.xlu2 %2293, %v3307_v22   ;;  %v1479_v52 = vpop.permute.xlu2 %1478  ;;  %1630 = vperm.xlu1 %2292, %v3291_v19   ;;  %v1442_v22 = vpop.permute.xlu0 %1441 }
 0x387   : > { %1535 = vst.msk [vmem:[%s2440_s23 + $0x28] sm:$0xff] %vm885_vm8, %v1479_v52 }
 0x388   : > { %1466 = vst.msk [vmem:[%s2440_s23 + $0xd0] sm:$0xff] %vm1452_vm15, %v1442_v22  ;;  %v2387_v22 = vmov 14  }
 0x389   : > { %1766 = vperm.xlu0 %2295, %v3351_v3  }
 0x38d   : > { %v1434_v53 = vpop.permute.xlu1 %1433 }
 0x38e   : > { %1464 = vst.msk [vmem:[%s2440_s23 + $0xb0] sm:$0xff] %vm1452_vm15, %v1434_v53  ;;  %1646 = vperm.xlu2 %2293, %v3279_v16   ;;  %v1487_v54 = vpop.permute.xlu2 %1486  ;;  %1642 = vperm.xlu1 %2292, %v3302_v21   ;;  %v1471_v21 = vpop.permute.xlu0 %1470 }
 0x38f   : > { %1537 = vst.msk [vmem:[%s2440_s23 + $0x48] sm:$0xff] %vm885_vm8, %v1487_v54 }
 0x390   : > { %1533 = vst.msk [vmem:[%s2440_s23 + $0x8] sm:$0xff] %vm885_vm8, %v1471_v21 }
 0x391   : > { %2299 = vset.pattern.permute.xlu0 %v2385_v62 }
 0x392   : > { %1794 = vperm.xlu0 %2299, %v3830_v61  }
 0x395   : > { %v1446_v56 = vpop.permute.xlu1 %1445 }
 0x396   : > { %1467 = vst.msk [vmem:[%s2440_s23 + $0xe0] sm:$0xff] %vm1452_vm15, %v1446_v56  ;;  %1654 = vperm.xlu2 %2293, %v3325_v25   ;;  %v1499_v16 = vpop.permute.xlu2 %1498  ;;  %1650 = vperm.xlu1 %2292, %v3297_v20   ;;  %v1491_v25 = vpop.permute.xlu0 %1490 }
 0x397   : > { %1540 = vst.msk [vmem:[%s2440_s23 + $0x78] sm:$0xff] %vm885_vm8, %v1499_v16 }
 0x398   : > { %1538 = vst.msk [vmem:[%s2440_s23 + $0x58] sm:$0xff] %vm885_vm8, %v1491_v25 }
 0x39a   : > { %1814 = vperm.xlu0 %2299, %v3859_v9  }
 0x39e   : > { %1666 = vperm.xlu2 %2293, %v3343_v1   ;;  %v1511_v19 = vpop.permute.xlu2 %1510  ;;  %1662 = vperm.xlu1 %2292, %v3315_v23   ;;  %v1475_v57 = vpop.permute.xlu1 %1474 }
 0x39f   : > { %1543 = vst.msk [vmem:[%s2440_s23 + $0xa8] sm:$0xff] %vm885_vm8, %v1511_v19  ;;  %v1503_v58 = vpop.permute.xlu0 %1502 }
 0x3a0   : > { %1534 = vst.msk [vmem:[%s2440_s23 + $0x18] sm:$0xff] %vm885_vm8, %v1475_v57 }
 0x3a1   : > { %1541 = vst.msk [vmem:[%s2440_s23 + $0x88] sm:$0xff] %vm885_vm8, %v1503_v58 }
 0x3a2   : > { %1826 = vperm.xlu0 %2299, %v3878_v14  }
 0x3a6   : > { %1678 = vperm.xlu2 %2293, %v3361_v2   ;;  %v1523_v20 = vpop.permute.xlu2 %1522  ;;  %1674 = vperm.xlu1 %2292, %v3333_v26   ;;  %v1483_v1 = vpop.permute.xlu1 %1482 }
 0x3a7   : > { %1546 = vst.msk [vmem:[%s2440_s23 + $0xd8] sm:$0xff] %vm885_vm8, %v1523_v20  ;;  %v1515_v59 = vpop.permute.xlu0 %1514 }
 0x3a8   : > { %1536 = vst.msk [vmem:[%s2440_s23 + $0x38] sm:$0xff] %vm885_vm8, %v1483_v1 }
 0x3a9   : > { %1544 = vst.msk [vmem:[%s2440_s23 + $0xb8] sm:$0xff] %vm885_vm8, %v1515_v59 }
 0x3aa   : > { %1838 = vperm.xlu0 %2299, %v3897_v30  }
 0x3ae   : > { %1690 = vperm.xlu2 %2293, %v3369_v5   ;;  %1686 = vperm.xlu1 %2292, %v3351_v3   ;;  %v1495_v23 = vpop.permute.xlu1 %1494  ;;  %v3824_v5 = vld [vmem:[%s4226_s1 + $0x10] sm:$0xff] }
 0x3af   : > { %1539 = vst.msk [vmem:[%s2440_s23 + $0x68] sm:$0xff] %vm885_vm8, %v1495_v23  ;;  %v1551_v2 = vpop.permute.xlu2 %1550  ;;  %v1527_v3 = vpop.permute.xlu0 %1526 }
 0x3b0   : > { %1613 = vst.msk [vmem:[%s2440_s23 + $0x8] sm:$0xff] %vm966_vm9, %v1551_v2 }
 0x3b1   : > { %1547 = vst.msk [vmem:[%s2440_s23 + $0xe8] sm:$0xff] %vm885_vm8, %v1527_v3  ;;  %v2388_v3 = vmov 15  }
 0x3b2   : > { %1850 = vperm.xlu0 %2299, %v3916_v35  }
 0x3b6   : > { %2297 = vset.pattern.permute.xlu2 %v2384_v55  ;;  %2296 = vset.pattern.permute.xlu1 %v2384_v55  ;;  %v1507_v26 = vpop.permute.xlu1 %1506 }
 0x3b7   : > { %1542 = vst.msk [vmem:[%s2440_s23 + $0x98] sm:$0xff] %vm885_vm8, %v1507_v26  ;;  %1718 = vperm.xlu2 %2297, %v3824_v5   ;;  %v1563_v60 = vpop.permute.xlu2 %1562  ;;  %1714 = vperm.xlu1 %2296, %v3830_v61   ;;  %v1555_v8 = vpop.permute.xlu0 %1554 }
 0x3b8   : > { %1616 = vst.msk [vmem:[%s2440_s23 + $0x38] sm:$0xff] %vm966_vm9, %v1563_v60 }
 0x3b9   : > { %1614 = vst.msk [vmem:[%s2440_s23 + $0x18] sm:$0xff] %vm966_vm9, %v1555_v8 }
 0x3ba   : > { %2303 = vset.pattern.permute.xlu0 %v2386_v42 }
 0x3bb   : > { %1878 = vperm.xlu0 %2303, %v3824_v5  }
 0x3be   : > { %v1519_v63 = vpop.permute.xlu1 %1518 }
 0x3bf   : > { %1545 = vst.msk [vmem:[%s2440_s23 + $0xc8] sm:$0xff] %vm885_vm8, %v1519_v63  ;;  %1726 = vperm.xlu2 %2297, %v3843_v18   ;;  %v1571_v6 = vpop.permute.xlu2 %1570  ;;  %1722 = vperm.xlu1 %2296, %v3849_v7   ;;  %v1575_v13 = vpop.permute.xlu0 %1574 }
 0x3c0   : > { %1618 = vst.msk [vmem:[%s2440_s23 + $0x58] sm:$0xff] %vm966_vm9, %v1571_v6 }
 0x3c1   : > { %1619 = vst.msk [vmem:[%s2440_s23 + $0x68] sm:$0xff] %vm966_vm9, %v1575_v13 }
 0x3c3   : > { %1898 = vperm.xlu0 %2303, %v3867_v11  }
 0x3c6   : > { %v1531_v10 = vpop.permute.xlu1 %1530 }
 0x3c7   : > { %1548 = vst.msk [vmem:[%s2440_s23 + $0xf8] sm:$0xff] %vm885_vm8, %v1531_v10  ;;  %1738 = vperm.xlu2 %2297, %v3867_v11   ;;  %v1583_v12 = vpop.permute.xlu2 %1582  ;;  %1734 = vperm.xlu1 %2296, %v3859_v9   ;;  %v1587_v29 = vpop.permute.xlu0 %1586 }
 0x3c8   : > { %1621 = vst.msk [vmem:[%s2440_s23 + $0x88] sm:$0xff] %vm966_vm9, %v1583_v12 }
 0x3c9   : > { %1622 = vst.msk [vmem:[%s2440_s23 + $0x98] sm:$0xff] %vm966_vm9, %v1587_v29 }
 0x3cb   : > { %1910 = vperm.xlu0 %2303, %v3884_v27  }
 0x3cf   : > { %1750 = vperm.xlu2 %2297, %v3884_v27   ;;  %v1595_v15 = vpop.permute.xlu2 %1594  ;;  %1746 = vperm.xlu1 %2296, %v3878_v14   ;;  %v1559_v28 = vpop.permute.xlu1 %1558 }
 0x3d0   : > { %1624 = vst.msk [vmem:[%s2440_s23 + $0xb8] sm:$0xff] %vm966_vm9, %v1595_v15  ;;  %v1599_v34 = vpop.permute.xlu0 %1598 }
 0x3d1   : > { %1615 = vst.msk [vmem:[%s2440_s23 + $0x28] sm:$0xff] %vm966_vm9, %v1559_v28 }
 0x3d2   : > { %1625 = vst.msk [vmem:[%s2440_s23 + $0xc8] sm:$0xff] %vm966_vm9, %v1599_v34 }
 0x3d3   : > { %1922 = vperm.xlu0 %2303, %v3903_v31  }
 0x3d7   : > { %1762 = vperm.xlu2 %2297, %v3903_v31   ;;  %v1607_v32 = vpop.permute.xlu2 %1606  ;;  %1758 = vperm.xlu1 %2296, %v3897_v30   ;;  %v1567_v33 = vpop.permute.xlu1 %1566 }
 0x3d8   : > { %1627 = vst.msk [vmem:[%s2440_s23 + $0xe8] sm:$0xff] %vm966_vm9, %v1607_v32  ;;  %v1611_v39 = vpop.permute.xlu0 %1610 }
 0x3d9   : > { %1617 = vst.msk [vmem:[%s2440_s23 + $0x48] sm:$0xff] %vm966_vm9, %v1567_v33 }
 0x3da   : > { %1628 = vst.msk [vmem:[%s2440_s23 + $0xf8] sm:$0xff] %vm966_vm9, %v1611_v39 }
 0x3db   : > { %2304 = vset.pattern.permute.xlu0 %v2387_v22 }
 0x3dc   : > { %1950 = vperm.xlu0 %2304, %v3925_v37  }
 0x3df   : > { %2298 = vset.pattern.permute.xlu2 %v2385_v62  ;;  %1770 = vperm.xlu1 %2296, %v3916_v35   ;;  %v1579_v36 = vpop.permute.xlu1 %1578 }
 0x3e0   : > { %1620 = vst.msk [vmem:[%s2440_s23 + $0x78] sm:$0xff] %vm966_vm9, %v1579_v36  ;;  %1790 = vperm.xlu2 %2298, %v3925_v37   ;;  %v1635_v38 = vpop.permute.xlu2 %1634  ;;  %v1639_v43 = vpop.permute.xlu0 %1638 }
 0x3e1   : > { %1694 = vst.msk [vmem:[%s2440_s23 + $0x18] sm:$0xff] %vm1047_vm10, %v1635_v38 }
 0x3e2   : > { %1695 = vst.msk [vmem:[%s2440_s23 + $0x28] sm:$0xff] %vm1047_vm10, %v1639_v43 }
 0x3e4   : > { %1970 = vperm.xlu0 %2304, %v3946_v45  }
 0x3e7   : > { %2300 = vset.pattern.permute.xlu1 %v2385_v62  ;;  %v1591_v40 = vpop.permute.xlu1 %1590 }
 0x3e8   : > { %1623 = vst.msk [vmem:[%s2440_s23 + $0xa8] sm:$0xff] %vm966_vm9, %v1591_v40  ;;  %1802 = vperm.xlu2 %2298, %v3849_v7   ;;  %v1647_v41 = vpop.permute.xlu2 %1646  ;;  %1798 = vperm.xlu1 %2300, %v3824_v5   ;;  %v1659_v17 = vpop.permute.xlu0 %1658 }
 0x3e9   : > { %1697 = vst.msk [vmem:[%s2440_s23 + $0x48] sm:$0xff] %vm1047_vm10, %v1647_v41 }
 0x3ea   : > { %1700 = vst.msk [vmem:[%s2440_s23 + $0x78] sm:$0xff] %vm1047_vm10, %v1659_v17 }
 0x3ec   : > { %1982 = vperm.xlu0 %2304, %v3958_v47  }
 0x3ef   : > { %v1603_v44 = vpop.permute.xlu1 %1602 }
 0x3f0   : > { %1626 = vst.msk [vmem:[%s2440_s23 + $0xd8] sm:$0xff] %vm966_vm9, %v1603_v44  ;;  %1810 = vperm.xlu2 %2298, %v3946_v45   ;;  %v1655_v46 = vpop.permute.xlu2 %1654  ;;  %1806 = vperm.xlu1 %2300, %v3843_v18   ;;  %v1671_v49 = vpop.permute.xlu0 %1670 }
 0x3f1   : > { %1699 = vst.msk [vmem:[%s2440_s23 + $0x68] sm:$0xff] %vm1047_vm10, %v1655_v46 }
 0x3f2   : > { %1703 = vst.msk [vmem:[%s2440_s23 + $0xa8] sm:$0xff] %vm1047_vm10, %v1671_v49 }
 0x3f4   : > { %1994 = vperm.xlu0 %2304, %v3972_v50  }
 0x3f8   : > { %1822 = vperm.xlu2 %2298, %v3958_v47   ;;  %v1667_v48 = vpop.permute.xlu2 %1666  ;;  %1818 = vperm.xlu1 %2300, %v3867_v11   ;;  %v1631_v24 = vpop.permute.xlu1 %1630 }
 0x3f9   : > { %1702 = vst.msk [vmem:[%s2440_s23 + $0x98] sm:$0xff] %vm1047_vm10, %v1667_v48  ;;  %v1683_v52 = vpop.permute.xlu0 %1682 }
 0x3fa   : > { %1693 = vst.msk [vmem:[%s2440_s23 + $0x8] sm:$0xff] %vm1047_vm10, %v1631_v24 }
 0x3fb   : > { %1706 = vst.msk [vmem:[%s2440_s23 + $0xd8] sm:$0xff] %vm1047_vm10, %v1683_v52 }
 0x3fc   : > { %2006 = vperm.xlu0 %2304, %v3986_v4  }
 0x400   : > { %1834 = vperm.xlu2 %2298, %v3972_v50   ;;  %v1679_v0 = vpop.permute.xlu2 %1678  ;;  %1830 = vperm.xlu1 %2300, %v3884_v27   ;;  %v1643_v51 = vpop.permute.xlu1 %1642 }
 0x401   : > { %1705 = vst.msk [vmem:[%s2440_s23 + $0xc8] sm:$0xff] %vm1047_vm10, %v1679_v0  ;;  %v1711_v55 = vpop.permute.xlu0 %1710 }
 0x402   : > { %1696 = vst.msk [vmem:[%s2440_s23 + $0x38] sm:$0xff] %vm1047_vm10, %v1643_v51 }
 0x403   : > { %1773 = vst.msk [vmem:[%s2440_s23 + $0x8] sm:$0xff] %vm1128_vm11, %v1711_v55 }
 0x404   : > { %2308 = vset.pattern.permute.xlu0 %v2388_v3 }
 0x405   : > { %2034 = vperm.xlu0 %2308, %v3830_v61  }
 0x408   : > { %1846 = vperm.xlu2 %2298, %v3986_v4   ;;  %v1691_v53 = vpop.permute.xlu2 %1690  ;;  %1842 = vperm.xlu1 %2300, %v3903_v31   ;;  %v1651_v54 = vpop.permute.xlu1 %1650 }
 0x409   : > { %1708 = vst.msk [vmem:[%s2440_s23 + $0xf8] sm:$0xff] %vm1047_vm10, %v1691_v53  ;;  %v1731_v21 = vpop.permute.xlu0 %1730 }
 0x40a   : > { %1698 = vst.msk [vmem:[%s2440_s23 + $0x58] sm:$0xff] %vm1047_vm10, %v1651_v54 }
 0x40b   : > { %1778 = vst.msk [vmem:[%s2440_s23 + $0x58] sm:$0xff] %vm1128_vm11, %v1731_v21 }
 0x40d   : > { %2054 = vperm.xlu0 %2308, %v3859_v9  }
 0x410   : > { %2302 = vset.pattern.permute.xlu2 %v2386_v42  ;;  %2301 = vset.pattern.permute.xlu1 %v2386_v42  ;;  %v1663_v56 = vpop.permute.xlu1 %1662 }
 0x411   : > { %1701 = vst.msk [vmem:[%s2440_s23 + $0x88] sm:$0xff] %vm1047_vm10, %v1663_v56  ;;  %1874 = vperm.xlu2 %2302, %v3830_v61   ;;  %v1719_v16 = vpop.permute.xlu2 %1718  ;;  %1870 = vperm.xlu1 %2301, %v3925_v37   ;;  %v1743_v25 = vpop.permute.xlu0 %1742 }
 0x412   : > { %1775 = vst.msk [vmem:[%s2440_s23 + $0x28] sm:$0xff] %vm1128_vm11, %v1719_v16 }
 0x413   : > { %1781 = vst.msk [vmem:[%s2440_s23 + $0x88] sm:$0xff] %vm1128_vm11, %v1743_v25 }
 0x415   : > { %2066 = vperm.xlu0 %2308, %v3878_v14  }
 0x418   : > { %v1675_v19 = vpop.permute.xlu1 %1674 }
 0x419   : > { %1704 = vst.msk [vmem:[%s2440_s23 + $0xb8] sm:$0xff] %vm1047_vm10, %v1675_v19  ;;  %1886 = vperm.xlu2 %2302, %v3843_v18   ;;  %v1727_v57 = vpop.permute.xlu2 %1726  ;;  %1882 = vperm.xlu1 %2301, %v3849_v7   ;;  %v1755_v58 = vpop.permute.xlu0 %1754 }
 0x41a   : > { %1777 = vst.msk [vmem:[%s2440_s23 + $0x48] sm:$0xff] %vm1128_vm11, %v1727_v57 }
 0x41b   : > { %1784 = vst.msk [vmem:[%s2440_s23 + $0xb8] sm:$0xff] %vm1128_vm11, %v1755_v58 }
 0x41d   : > { %2078 = vperm.xlu0 %2308, %v3897_v30  }
 0x420   : > { %v1687_v20 = vpop.permute.xlu1 %1686 }
 0x421   : > { %1707 = vst.msk [vmem:[%s2440_s23 + $0xe8] sm:$0xff] %vm1047_vm10, %v1687_v20  ;;  %1894 = vperm.xlu2 %2302, %v3859_v9   ;;  %v1739_v1 = vpop.permute.xlu2 %1738  ;;  %1890 = vperm.xlu1 %2301, %v3946_v45   ;;  %v1767_v59 = vpop.permute.xlu0 %1766 }
 0x422   : > { %1780 = vst.msk [vmem:[%s2440_s23 + $0x78] sm:$0xff] %vm1128_vm11, %v1739_v1 }
 0x423   : > { %1787 = vst.msk [vmem:[%s2440_s23 + $0xe8] sm:$0xff] %vm1128_vm11, %v1767_v59 }
 0x425   : > { %2090 = vperm.xlu0 %2308, %v3916_v35  }
 0x429   : > { %1906 = vperm.xlu2 %2302, %v3878_v14   ;;  %v1751_v23 = vpop.permute.xlu2 %1750  ;;  %1902 = vperm.xlu1 %2301, %v3958_v47   ;;  %v1715_v2 = vpop.permute.xlu1 %1714 }
 0x42a   : > { %1783 = vst.msk [vmem:[%s2440_s23 + $0xa8] sm:$0xff] %vm1128_vm11, %v1751_v23  ;;  %v1795_v62 = vpop.permute.xlu0 %1794 }
 0x42b   : > { %1774 = vst.msk [vmem:[%s2440_s23 + $0x18] sm:$0xff] %vm1128_vm11, %v1715_v2 }
 0x42c   : > { %1854 = vst.msk [vmem:[%s2440_s23 + $0x18] sm:$0xff] %vm1209_vm12, %v1795_v62 }
 0x431   : > { %1918 = vperm.xlu2 %2302, %v3897_v30   ;;  %v1763_v26 = vpop.permute.xlu2 %1762  ;;  %1914 = vperm.xlu1 %2301, %v3972_v50   ;;  %v1723_v60 = vpop.permute.xlu1 %1722 }
 0x432   : > { %1786 = vst.msk [vmem:[%s2440_s23 + $0xd8] sm:$0xff] %vm1128_vm11, %v1763_v26  ;;  %v1815_v8 = vpop.permute.xlu0 %1814 }
 0x433   : > { %1776 = vst.msk [vmem:[%s2440_s23 + $0x38] sm:$0xff] %vm1128_vm11, %v1723_v60 }
 0x439   : > { %1930 = vperm.xlu2 %2302, %v3916_v35   ;;  %1926 = vperm.xlu1 %2301, %v3986_v4   ;;  %v1735_v63 = vpop.permute.xlu1 %1734 }
 0x43a   : > { %1779 = vst.msk [vmem:[%s2440_s23 + $0x68] sm:$0xff] %vm1128_vm11, %v1735_v63  ;;  %v1791_v6 = vpop.permute.xlu2 %1790  ;;  %v1827_v13 = vpop.permute.xlu0 %1826 }
 0x43b   : > { %1853 = vst.msk [vmem:[%s2440_s23 + $0x8] sm:$0xff] %vm1209_vm12, %v1791_v6 }
 0x43c   : > { %1859 = vst.msk [vmem:[%s2440_s23 + $0x68] sm:$0xff] %vm1209_vm12, %v1815_v8 }
 0x441   : > { %2306 = vset.pattern.permute.xlu2 %v2387_v22  ;;  %2305 = vset.pattern.permute.xlu1 %v2387_v22  ;;  %v1747_v10 = vpop.permute.xlu1 %1746 }
 0x442   : > { %1782 = vst.msk [vmem:[%s2440_s23 + $0x98] sm:$0xff] %vm1128_vm11, %v1747_v10  ;;  %1958 = vperm.xlu2 %2306, %v3824_v5   ;;  %v1803_v12 = vpop.permute.xlu2 %1802  ;;  %1954 = vperm.xlu1 %2305, %v3830_v61   ;;  %v1839_v61 = vpop.permute.xlu0 %1838 }
 0x443   : > { %1856 = vst.msk [vmem:[%s2440_s23 + $0x38] sm:$0xff] %vm1209_vm12, %v1803_v12 }
 0x444   : > { %1862 = vst.msk [vmem:[%s2440_s23 + $0x98] sm:$0xff] %vm1209_vm12, %v1827_v13 }
 0x449   : > { %v1759_v15 = vpop.permute.xlu1 %1758 }
 0x44a   : > { %1785 = vst.msk [vmem:[%s2440_s23 + $0xc8] sm:$0xff] %vm1128_vm11, %v1759_v15  ;;  %1966 = vperm.xlu2 %2306, %v3843_v18   ;;  %v1811_v28 = vpop.permute.xlu2 %1810  ;;  %1962 = vperm.xlu1 %2305, %v3849_v7   ;;  %v1851_v33 = vpop.permute.xlu0 %1850 }
 0x44b   : > { %1858 = vst.msk [vmem:[%s2440_s23 + $0x58] sm:$0xff] %vm1209_vm12, %v1811_v28 }
 0x44c   : > { %1865 = vst.msk [vmem:[%s2440_s23 + $0xc8] sm:$0xff] %vm1209_vm12, %v1839_v61 }
 0x451   : > { %v1771_v29 = vpop.permute.xlu1 %1770 }
 0x452   : > { %1788 = vst.msk [vmem:[%s2440_s23 + $0xf8] sm:$0xff] %vm1128_vm11, %v1771_v29  ;;  %1978 = vperm.xlu2 %2306, %v3867_v11   ;;  %v1823_v32 = vpop.permute.xlu2 %1822  ;;  %1974 = vperm.xlu1 %2305, %v3859_v9   ;;  %v1879_v9 = vpop.permute.xlu0 %1878 }
 0x453   : > { %1861 = vst.msk [vmem:[%s2440_s23 + $0x88] sm:$0xff] %vm1209_vm12, %v1823_v32 }
 0x454   : > { %1868 = vst.msk [vmem:[%s2440_s23 + $0xf8] sm:$0xff] %vm1209_vm12, %v1851_v33 }
 0x45a   : > { %1990 = vperm.xlu2 %2306, %v3884_v27   ;;  %v1835_v34 = vpop.permute.xlu2 %1834  ;;  %1986 = vperm.xlu1 %2305, %v3878_v14   ;;  %v1799_v36 = vpop.permute.xlu1 %1798 }
 0x45b   : > { %1864 = vst.msk [vmem:[%s2440_s23 + $0xb8] sm:$0xff] %vm1209_vm12, %v1835_v34  ;;  %v1899_v14 = vpop.permute.xlu0 %1898 }
 0x45c   : > { %1855 = vst.msk [vmem:[%s2440_s23 + $0x28] sm:$0xff] %vm1209_vm12, %v1799_v36 }
 0x45d   : > { %1935 = vst.msk [vmem:[%s2440_s23 + $0x28] sm:$0xff] %vm1290_vm13, %v1879_v9 }
 0x462   : > { %2002 = vperm.xlu2 %2306, %v3903_v31   ;;  %v1847_v38 = vpop.permute.xlu2 %1846  ;;  %1998 = vperm.xlu1 %2305, %v3897_v30   ;;  %v1807_v39 = vpop.permute.xlu1 %1806 }
 0x463   : > { %1867 = vst.msk [vmem:[%s2440_s23 + $0xe8] sm:$0xff] %vm1209_vm12, %v1847_v38  ;;  %v1911_v41 = vpop.permute.xlu0 %1910 }
 0x464   : > { %1857 = vst.msk [vmem:[%s2440_s23 + $0x48] sm:$0xff] %vm1209_vm12, %v1807_v39 }
 0x46a   : > { %2307 = vset.pattern.permute.xlu2 %v2388_v3  ;;  %2010 = vperm.xlu1 %2305, %v3916_v35   ;;  %v1819_v40 = vpop.permute.xlu1 %1818 }
 0x46b   : > { %1860 = vst.msk [vmem:[%s2440_s23 + $0x78] sm:$0xff] %vm1209_vm12, %v1819_v40  ;;  %2030 = vperm.xlu2 %2307, %v3925_v37   ;;  %v1875_v30 = vpop.permute.xlu2 %1874  ;;  %v1923_v37 = vpop.permute.xlu0 %1922 }
 0x46c   : > { %1934 = vst.msk [vmem:[%s2440_s23 + $0x18] sm:$0xff] %vm1290_vm13, %v1875_v30 }
 0x46d   : > { %1940 = vst.msk [vmem:[%s2440_s23 + $0x78] sm:$0xff] %vm1290_vm13, %v1899_v14 }
 0x472   : > { %2309 = vset.pattern.permute.xlu1 %v2388_v3  ;;  %v1831_v42 = vpop.permute.xlu1 %1830 }
 0x473   : > { %1863 = vst.msk [vmem:[%s2440_s23 + $0xa8] sm:$0xff] %vm1209_vm12, %v1831_v42  ;;  %2042 = vperm.xlu2 %2307, %v3849_v7   ;;  %v1887_v35 = vpop.permute.xlu2 %1886  ;;  %2038 = vperm.xlu1 %2309, %v3824_v5   ;;  %v1951_v5 = vpop.permute.xlu0 %1950 }
 0x474   : > { %1937 = vst.msk [vmem:[%s2440_s23 + $0x48] sm:$0xff] %vm1290_vm13, %v1887_v35 }
 0x475   : > { %1943 = vst.msk [vmem:[%s2440_s23 + $0xa8] sm:$0xff] %vm1290_vm13, %v1911_v41 }
 0x47a   : > { %v1843_v43 = vpop.permute.xlu1 %1842 }
 0x47b   : > { %1866 = vst.msk [vmem:[%s2440_s23 + $0xd8] sm:$0xff] %vm1209_vm12, %v1843_v43  ;;  %2050 = vperm.xlu2 %2307, %v3946_v45   ;;  %v1895_v44 = vpop.permute.xlu2 %1894  ;;  %2046 = vperm.xlu1 %2309, %v3843_v18   ;;  %v1971_v18 = vpop.permute.xlu0 %1970 }
 0x47c   : > { %1939 = vst.msk [vmem:[%s2440_s23 + $0x68] sm:$0xff] %vm1290_vm13, %v1895_v44 }
 0x47d   : > { %1946 = vst.msk [vmem:[%s2440_s23 + $0xd8] sm:$0xff] %vm1290_vm13, %v1923_v37 }
 0x483   : > { %2062 = vperm.xlu2 %2307, %v3958_v47   ;;  %v1907_v7 = vpop.permute.xlu2 %1906  ;;  %2058 = vperm.xlu1 %2309, %v3867_v11   ;;  %v1871_v46 = vpop.permute.xlu1 %1870 }
 0x484   : > { %1942 = vst.msk [vmem:[%s2440_s23 + $0x98] sm:$0xff] %vm1290_vm13, %v1907_v7 }
 0x485   : > { %1933 = vst.msk [vmem:[%s2440_s23 + $0x8] sm:$0xff] %vm1290_vm13, %v1871_v46 }
 0x486   : > { %2013 = vst.msk [vmem:[%s2440_s23 + $0x8] sm:$0xff] %vm1371_vm14, %v1951_v5 }
 0x48b   : > { %2074 = vperm.xlu2 %2307, %v3972_v50   ;;  %v1919_v45 = vpop.permute.xlu2 %1918  ;;  %2070 = vperm.xlu1 %2309, %v3884_v27   ;;  %v1883_v11 = vpop.permute.xlu1 %1882 }
 0x48c   : > { %1945 = vst.msk [vmem:[%s2440_s23 + $0xc8] sm:$0xff] %vm1290_vm13, %v1919_v45  ;;  %v1983_v27 = vpop.permute.xlu0 %1982 }
 0x48d   : > { %1936 = vst.msk [vmem:[%s2440_s23 + $0x38] sm:$0xff] %vm1290_vm13, %v1883_v11 }
 0x493   : > { %2086 = vperm.xlu2 %2307, %v3986_v4   ;;  %v1931_v17 = vpop.permute.xlu2 %1930  ;;  %2082 = vperm.xlu1 %2309, %v3903_v31   ;;  %v1891_v47 = vpop.permute.xlu1 %1890 }
 0x494   : > { %1948 = vst.msk [vmem:[%s2440_s23 + $0xf8] sm:$0xff] %vm1290_vm13, %v1931_v17  ;;  %v1995_v31 = vpop.permute.xlu0 %1994 }
 0x495   : > { %1938 = vst.msk [vmem:[%s2440_s23 + $0x58] sm:$0xff] %vm1290_vm13, %v1891_v47 }
 0x496   : > { %2018 = vst.msk [vmem:[%s2440_s23 + $0x58] sm:$0xff] %vm1371_vm14, %v1971_v18 }
 0x49b   : > { %v1903_v48 = vpop.permute.xlu1 %1902 }
 0x49c   : > { %1941 = vst.msk [vmem:[%s2440_s23 + $0x88] sm:$0xff] %vm1290_vm13, %v1903_v48  ;;  %v1959_v24 = vpop.permute.xlu2 %1958  ;;  %v2007_v0 = vpop.permute.xlu0 %2006 }
 0x49d   : > { %2015 = vst.msk [vmem:[%s2440_s23 + $0x28] sm:$0xff] %vm1371_vm14, %v1959_v24 }
 0x49e   : > { %2021 = vst.msk [vmem:[%s2440_s23 + $0x88] sm:$0xff] %vm1371_vm14, %v1983_v27 }
 0x4a3   : > { %v1915_v49 = vpop.permute.xlu1 %1914 }
 0x4a4   : > { %1944 = vst.msk [vmem:[%s2440_s23 + $0xb8] sm:$0xff] %vm1290_vm13, %v1915_v49  ;;  %v1967_v50 = vpop.permute.xlu2 %1966  ;;  %v2035_v4 = vpop.permute.xlu0 %2034 }
 0x4a5   : > { %2017 = vst.msk [vmem:[%s2440_s23 + $0x48] sm:$0xff] %vm1371_vm14, %v1967_v50 }
 0x4a6   : > { %2024 = vst.msk [vmem:[%s2440_s23 + $0xb8] sm:$0xff] %vm1371_vm14, %v1995_v31 }
 0x4ab   : > { %v1927_v51 = vpop.permute.xlu1 %1926 }
 0x4ac   : > { %1947 = vst.msk [vmem:[%s2440_s23 + $0xe8] sm:$0xff] %vm1290_vm13, %v1927_v51  ;;  %v1979_v52 = vpop.permute.xlu2 %1978  ;;  %v2055_v56 = vpop.permute.xlu0 %2054 }
 0x4ad   : > { %2020 = vst.msk [vmem:[%s2440_s23 + $0x78] sm:$0xff] %vm1371_vm14, %v1979_v52 }
 0x4ae   : > { %2027 = vst.msk [vmem:[%s2440_s23 + $0xe8] sm:$0xff] %vm1371_vm14, %v2007_v0 }
 0x4b4   : > { %v1991_v53 = vpop.permute.xlu2 %1990  ;;  %v1955_v54 = vpop.permute.xlu1 %1954 }
 0x4b5   : > { %2023 = vst.msk [vmem:[%s2440_s23 + $0xa8] sm:$0xff] %vm1371_vm14, %v1991_v53  ;;  %v2067_v19 = vpop.permute.xlu0 %2066 }
 0x4b6   : > { %2014 = vst.msk [vmem:[%s2440_s23 + $0x18] sm:$0xff] %vm1371_vm14, %v1955_v54 }
 0x4b7   : > { %2094 = vst.msk [vmem:[%s2440_s23 + $0x18] sm:$0xff] %vm1452_vm15, %v2035_v4 }
 0x4bc   : > { %v2003_v22 = vpop.permute.xlu2 %2002  ;;  %v1963_v55 = vpop.permute.xlu1 %1962 }
 0x4bd   : > { %2026 = vst.msk [vmem:[%s2440_s23 + $0xd8] sm:$0xff] %vm1371_vm14, %v2003_v22  ;;  %v2079_v20 = vpop.permute.xlu0 %2078 }
 0x4be   : > { %2016 = vst.msk [vmem:[%s2440_s23 + $0x38] sm:$0xff] %vm1371_vm14, %v1963_v55 }
 0x4c4   : > { %v1975_v16 = vpop.permute.xlu1 %1974 }
 0x4c5   : > { %2019 = vst.msk [vmem:[%s2440_s23 + $0x68] sm:$0xff] %vm1371_vm14, %v1975_v16  ;;  %v2031_v21 = vpop.permute.xlu2 %2030  ;;  %v2091_v2 = vpop.permute.xlu0 %2090 }
 0x4c6   : > { %2093 = vst.msk [vmem:[%s2440_s23 + $0x8] sm:$0xff] %vm1452_vm15, %v2031_v21 }
 0x4c7   : > { %2099 = vst.msk [vmem:[%s2440_s23 + $0x68] sm:$0xff] %vm1452_vm15, %v2055_v56 }
 0x4cc   : > { %v1987_v57 = vpop.permute.xlu1 %1986 }
 0x4cd   : > { %2022 = vst.msk [vmem:[%s2440_s23 + $0x98] sm:$0xff] %vm1371_vm14, %v1987_v57  ;;  %v2043_v25 = vpop.permute.xlu2 %2042 }
 0x4ce   : > { %2096 = vst.msk [vmem:[%s2440_s23 + $0x38] sm:$0xff] %vm1452_vm15, %v2043_v25 }
 0x4cf   : > { %2102 = vst.msk [vmem:[%s2440_s23 + $0x98] sm:$0xff] %vm1452_vm15, %v2067_v19 }
 0x4d4   : > { %v1999_v1 = vpop.permute.xlu1 %1998 }
 0x4d5   : > { %2025 = vst.msk [vmem:[%s2440_s23 + $0xc8] sm:$0xff] %vm1371_vm14, %v1999_v1  ;;  %v2051_v58 = vpop.permute.xlu2 %2050 }
 0x4d6   : > { %2098 = vst.msk [vmem:[%s2440_s23 + $0x58] sm:$0xff] %vm1452_vm15, %v2051_v58 }
 0x4d7   : > { %2105 = vst.msk [vmem:[%s2440_s23 + $0xc8] sm:$0xff] %vm1452_vm15, %v2079_v20 }
 0x4dc   : > { %v2011_v23 = vpop.permute.xlu1 %2010 }
 0x4dd   : > { %2028 = vst.msk [vmem:[%s2440_s23 + $0xf8] sm:$0xff] %vm1371_vm14, %v2011_v23  ;;  %v2063_v59 = vpop.permute.xlu2 %2062 }
 0x4de   : > { %2101 = vst.msk [vmem:[%s2440_s23 + $0x88] sm:$0xff] %vm1452_vm15, %v2063_v59 }
 0x4df   : > { %2108 = vst.msk [vmem:[%s2440_s23 + $0xf8] sm:$0xff] %vm1452_vm15, %v2091_v2 }
 0x4e5   : > { %v2075_v26 = vpop.permute.xlu2 %2074  ;;  %v2039_v60 = vpop.permute.xlu1 %2038 }
 0x4e6   : > { %2104 = vst.msk [vmem:[%s2440_s23 + $0xb8] sm:$0xff] %vm1452_vm15, %v2075_v26 }
 0x4e7   : > { %2095 = vst.msk [vmem:[%s2440_s23 + $0x28] sm:$0xff] %vm1452_vm15, %v2039_v60 }
 0x4ed   : > { %v2087_v3 = vpop.permute.xlu2 %2086  ;;  %v2047_v62 = vpop.permute.xlu1 %2046 }
 0x4ee   : > { %2107 = vst.msk [vmem:[%s2440_s23 + $0xe8] sm:$0xff] %vm1452_vm15, %v2087_v3 }
 0x4ef   : > { %2097 = vst.msk [vmem:[%s2440_s23 + $0x48] sm:$0xff] %vm1452_vm15, %v2047_v62 }
 0x4f5   : > { %v2059_v63 = vpop.permute.xlu1 %2058 }
 0x4f6   : > { %2100 = vst.msk [vmem:[%s2440_s23 + $0x78] sm:$0xff] %vm1452_vm15, %v2059_v63 }
 0x4fd   : > { %v2071_v6 = vpop.permute.xlu1 %2070 }
 0x4fe   : > { %2103 = vst.msk [vmem:[%s2440_s23 + $0xa8] sm:$0xff] %vm1452_vm15, %v2071_v6 }
 0x505   : > { %v2083_v8 = vpop.permute.xlu1 %2082 }
 0x506   : > { %2106 = vst.msk [vmem:[%s2440_s23 + $0xd8] sm:$0xff] %vm1452_vm15, %v2083_v8 }
 0x507 PF: > { %s12_s13 = sadd.s32 1, %s2364_s13   ;;  %s4228_s9 = smov %s2356_s11 }
 0x508   : > { %p9_p9 = scmp.ge.s32.totalorder %s12_s13, 6   ;;  %s4229_s10 = smov %s2360_s12 }
 0x509   : > { %s4230_s11 = smov %s4233_s14  ;;  %s4231_s12 = smov %s4237_s15 }
 0x50a   :  { %11 = sbr.rel (!%p9_p9) target bundleno = 3 (0x3), region = 63 }

</bundles_post_ra>
